<compile_context>
chip_gen: v7x
topology: tpu7x:2x2x1
jax: 0.10.0
libtpu: 0.0.40
codegen_flags: <defaults>
</compile_context>

<pallas_src>
import jax
import jax.numpy as jnp
from jax.experimental import pallas as pl
from jax.experimental.pallas import tpu as pltpu

LN_EPS = 1e-5  # PyTorch nn.LayerNorm default


def predictor_kernel(g_ref, q_ref, wrel_ref, brel_ref, w1a_ref, w1b_ref,
                     b1_ref, gamma_ref, beta_ref, w2_ref, b2_ref, out_ref):
    TB, G, H = g_ref.shape

    g = g_ref[...].astype(jnp.float32)        # (TB, G, H) graph representations
    q = q_ref[...].astype(jnp.float32)        # (TB, H)    un-replicated queries

    # --- FusionModule gate: sigmoid(query @ W_rel^T + b_rel) ---
    # Elementwise-reduce form keeps the gate on the sublane axis aligned with the
    # graph rows; an MXU (TB,H)@(H,G) gate would land on lanes and need a
    # lanes->sublanes relayout before the row scaling.
    q3 = q[:, None, :]                                            # (TB, 1, H)
    gate = jax.nn.sigmoid(
        jnp.sum(q3 * wrel_ref[...][None, :, :], axis=-1, keepdims=True)
        + brel_ref[...][None, :, :])                              # (TB, G, 1)
    scaled = g * gate          # row-wise scaling == diag matmul  # (TB, G, H)

    # --- Linear(2H, H) split: h @ W1^T = scaled @ W1a^T + q @ W1b^T ---
    # graph path: single (TB*G, H) x (H, H) MXU matmul
    za = jnp.dot(scaled.reshape(TB * G, H).astype(w1a_ref.dtype), w1a_ref[...],
                 preferred_element_type=jnp.float32).reshape(TB, G, H)
    # query path: computed once per batch element (identical across the G rows)
    qw = jnp.dot(q.astype(w1b_ref.dtype), w1b_ref[...],
                 preferred_element_type=jnp.float32)              # (TB, H)
    z = za + qw[:, None, :] + b1_ref[...][None, :, :]             # (TB, G, H)

    # --- LayerNorm(H), f32 ---
    mean = jnp.mean(z, axis=-1, keepdims=True)
    var = jnp.mean((z - mean) ** 2, axis=-1, keepdims=True)
    z = (z - mean) * jax.lax.rsqrt(var + LN_EPS)
    z = z * gamma_ref[...][None, :, :] + beta_ref[...][None, :, :]

    # --- ReLU ---
    z = jnp.maximum(z, 0.0)
    # TODO(synk): nn.Dropout is identity at inference; training-mode dropout not implemented.

    # --- final Linear(H, 1) ---
    logits = jnp.sum(z * w2_ref[...][None, :, :], axis=-1, keepdims=True)  # (TB, G, 1)
    out_ref[...] = (logits + b2_ref[0]).astype(out_ref.dtype)


def predictor_forward(graph_repr, query, params, *, batch_tile=32,
                      use_bf16_inputs=False):
    """Pallas forward of Predictor. graph_repr: (B, G, H), query: (B, H)."""
    B, G, H = graph_repr.shape
    assert query.shape == (B, H)
    assert params["w_rel"].shape == (G, H), "label_size must equal n_graphs"

    # --- batch tiling: TB batch elements per grid step ---
    if B <= batch_tile:
        TB, B_pad = B, B                       # single step, full-extent blocks
    else:
        TB = max(8, (batch_tile // 8) * 8)     # second-minor block dim needs 8-alignment
        B_pad = pl.cdiv(B, TB) * TB
    if B_pad != B:
        graph_repr = jnp.pad(graph_repr, ((0, B_pad - B), (0, 0), (0, 0)))
        query = jnp.pad(query, ((0, B_pad - B), (0, 0)))

    wrel = params["w_rel"]                      # (G, H)
    brel = params["b_rel"].reshape(G, 1)        # (G, 1)
    w1 = params["w1"]                           # (H, 2H)
    w1a_t = jnp.transpose(w1[:, :H])            # (H, H): multiplies scaled graph part
    w1b_t = jnp.transpose(w1[:, H:])            # (H, H): multiplies query part
    b1 = params["b1"].reshape(1, H)
    gamma = params["gamma"].reshape(1, H)
    beta = params["beta"].reshape(1, H)
    w2 = params["w2"].reshape(1, H)
    b2 = params["b2"].reshape(1)                # SMEM scalar

    if use_bf16_inputs:
        # v6e/v7x: halve HBM traffic of the dominant reads; the kernel keeps all
        # accumulation and the elementwise tail in f32 (v5e-safe as well).
        graph_repr = graph_repr.astype(jnp.bfloat16)
        w1a_t = w1a_t.astype(jnp.bfloat16)
        w1b_t = w1b_t.astype(jnp.bfloat16)

    def const_spec(arr):
        return pl.BlockSpec(arr.shape, lambda b: (0, 0))

    out = pl.pallas_call(
        predictor_kernel,
        out_shape=jax.ShapeDtypeStruct((B_pad, G, 1), jnp.float32),
        grid=(B_pad // TB,),
        in_specs=[
            pl.BlockSpec((TB, G, H), lambda b: (b, 0, 0)),   # graph_repr
            pl.BlockSpec((TB, H), lambda b: (b, 0)),         # query (NOT replicated)
            const_spec(wrel),    # W_rel
            const_spec(brel),    # b_rel
            const_spec(w1a_t),   # W1a^T
            const_spec(w1b_t),   # W1b^T
            const_spec(b1),      # b1
            const_spec(gamma),   # LN gamma
            const_spec(beta),    # LN beta
            const_spec(w2),      # W2
            pl.BlockSpec(memory_space=pltpu.MemorySpace.SMEM),   # b2 scalar
        ],
        out_specs=pl.BlockSpec((TB, G, 1), lambda b: (b, 0, 0)),
        compiler_params=pltpu.CompilerParams(
            dimension_semantics=("parallel",)),
    )(graph_repr, query, wrel, brel, w1a_t, w1b_t, b1, gamma, beta, w2, b2)

    return out[:B, :, 0]   # (B, G)


def reference_forward(graph_repr, query, params):
    """Pure-JAX reference of the PyTorch forward (eval mode)."""
    gate = jax.nn.sigmoid(query @ params["w_rel"].T + params["b_rel"])        # (B, G)
    scaled = graph_repr * gate[..., None]                                     # (B, G, H)
    qexp = jnp.broadcast_to(query[:, None, :], scaled.shape)
    h = jnp.concatenate([scaled, qexp], axis=-1)                              # (B, G, 2H)
    z = h @ params["w1"].T + params["b1"]
    mean = jnp.mean(z, -1, keepdims=True)
    var = jnp.mean((z - mean) ** 2, -1, keepdims=True)
    z = (z - mean) / jnp.sqrt(var + LN_EPS) * params["gamma"] + params["beta"]
    z = jnp.maximum(z, 0.0)
    return (z @ params["w2"].T + params["b2"])[..., 0]


def init_params(key, hidden_size, label_size):
    ks = jax.random.split(key, 6)
    scale = 0.1
    return {
        "w_rel": scale * jax.random.normal(ks[0], (label_size, hidden_size), jnp.float32),
        "b_rel": scale * jax.random.normal(ks[1], (label_size,), jnp.float32),
        "w1":    scale * jax.random.normal(ks[2], (hidden_size, 2 * hidden_size), jnp.float32),
        "b1":    scale * jax.random.normal(ks[3], (hidden_size,), jnp.float32),
        "gamma": jnp.ones((hidden_size,), jnp.float32),
        "beta":  jnp.zeros((hidden_size,), jnp.float32),
        "w2":    scale * jax.random.normal(ks[4], (1, hidden_size), jnp.float32),
        "b2":    scale * jax.random.normal(ks[5], (1,), jnp.float32),
    }


if __name__ == "__main__":
    # batch not a multiple of the batch tile -> exercises padding + 2-step grid.
    B, H, L = 40, 32, 8          # batch, hidden_size, label_size (== n_graphs)
    key = jax.random.PRNGKey(0)
    k_g, k_q, k_p = jax.random.split(key, 3)

    graph_repr = jax.random.normal(k_g, (B, L, H), jnp.float32)
    query = jax.random.normal(k_q, (B, H), jnp.float32)
    params = init_params(k_p, H, L)

    ref = reference_forward(graph_repr, query, params)

    # f32 path (exact PyTorch semantics)
    logits = jax.block_until_ready(predictor_forward(graph_repr, query, params))
    assert logits.shape == (B, L)
    assert jnp.allclose(logits, ref, atol=1e-4, rtol=1e-4), (logits, ref)

    # bf16-input path (v6e/v7x HBM-bandwidth optimization) — looser tolerance.
    logits_bf16 = jax.block_until_ready(
        predictor_forward(graph_repr, query, params, use_bf16_inputs=True))
    assert logits_bf16.shape == (B, L)
    assert jnp.allclose(logits_bf16, ref, atol=5e-2, rtol=5e-2), (logits_bf16, ref)

    print("KERNEL_OK")
</pallas_src>

<mosaic_0001>
module attributes {stable_mosaic.version = 11 : i64} {
  func.func @predictor_kernel(%arg0: i32, %arg1: memref<32x8x32xf32, #tpu.memory_space<vmem>>, %arg2: memref<32x32xf32, #tpu.memory_space<vmem>>, %arg3: memref<8x32xf32, #tpu.memory_space<vmem>>, %arg4: memref<8x1xf32, #tpu.memory_space<vmem>>, %arg5: memref<32x32xf32, #tpu.memory_space<vmem>>, %arg6: memref<32x32xf32, #tpu.memory_space<vmem>>, %arg7: memref<1x32xf32, #tpu.memory_space<vmem>>, %arg8: memref<1x32xf32, #tpu.memory_space<vmem>>, %arg9: memref<1x32xf32, #tpu.memory_space<vmem>>, %arg10: memref<1x32xf32, #tpu.memory_space<vmem>>, %arg11: memref<1xf32, #tpu.memory_space<smem>>, %arg12: memref<32x8x1xf32, #tpu.memory_space<vmem>>) attributes {dimension_semantics = [#tpu.dimension_semantics<parallel>], iteration_bounds = array<i64: 2>, scalar_prefetch = 0 : i64, scratch_operands = 0 : i64, tpu.core_type = #tpu.core_type<tc>, window_params = [{transform_indices = @transform_0, window_bounds = array<i64: 32, 8, 32>}, {transform_indices = @transform_1, window_bounds = array<i64: 32, 32>}, {pipeline_mode = #tpu.pipeline_mode<synchronous>, transform_indices = @transform_2, window_bounds = array<i64: 8, 32>}, {pipeline_mode = #tpu.pipeline_mode<synchronous>, transform_indices = @transform_3, window_bounds = array<i64: 8, 1>}, {pipeline_mode = #tpu.pipeline_mode<synchronous>, transform_indices = @transform_4, window_bounds = array<i64: 32, 32>}, {pipeline_mode = #tpu.pipeline_mode<synchronous>, transform_indices = @transform_5, window_bounds = array<i64: 32, 32>}, {pipeline_mode = #tpu.pipeline_mode<synchronous>, transform_indices = @transform_6, window_bounds = array<i64: 1, 32>}, {pipeline_mode = #tpu.pipeline_mode<synchronous>, transform_indices = @transform_7, window_bounds = array<i64: 1, 32>}, {pipeline_mode = #tpu.pipeline_mode<synchronous>, transform_indices = @transform_8, window_bounds = array<i64: 1, 32>}, {pipeline_mode = #tpu.pipeline_mode<synchronous>, transform_indices = @transform_9, window_bounds = array<i64: 1, 32>}, {transform_indices = @transform_10, window_bounds = array<i64: 1>}, {transform_indices = @transform_11, window_bounds = array<i64: 32, 8, 1>}]} {
    %c0 = arith.constant 0 : index
    %c0_0 = arith.constant 0 : index
    %c0_1 = arith.constant 0 : index
    %0 = vector.load %arg1[%c0, %c0_0, %c0_1] : memref<32x8x32xf32, #tpu.memory_space<vmem>>, vector<32x8x32xf32>
    %c0_2 = arith.constant 0 : index
    %c0_3 = arith.constant 0 : index
    %1 = vector.load %arg2[%c0_2, %c0_3] : memref<32x32xf32, #tpu.memory_space<vmem>>, vector<32x32xf32>
    %2 = vector.shape_cast %1 : vector<32x32xf32> to vector<32x1x32xf32>
    %c0_4 = arith.constant 0 : index
    %c0_5 = arith.constant 0 : index
    %3 = vector.load %arg3[%c0_4, %c0_5] : memref<8x32xf32, #tpu.memory_space<vmem>>, vector<8x32xf32>
    %4 = vector.shape_cast %3 : vector<8x32xf32> to vector<1x8x32xf32>
    %5 = vector.broadcast %2 : vector<32x1x32xf32> to vector<32x8x32xf32>
    %6 = vector.broadcast %4 : vector<1x8x32xf32> to vector<32x8x32xf32>
    %7 = arith.mulf %5, %6 : vector<32x8x32xf32>
    %cst = arith.constant dense<0.000000e+00> : vector<32x8xf32>
    %8 = vector.multi_reduction <add>, %7, %cst [2] : vector<32x8x32xf32> to vector<32x8xf32>
    %9 = vector.shape_cast %8 : vector<32x8xf32> to vector<32x8x1xf32>
    %c0_6 = arith.constant 0 : index
    %c0_7 = arith.constant 0 : index
    %10 = vector.load %arg4[%c0_6, %c0_7] : memref<8x1xf32, #tpu.memory_space<vmem>>, vector<8x1xf32>
    %11 = vector.shape_cast %10 : vector<8x1xf32> to vector<1x8x1xf32>
    %12 = vector.broadcast %11 : vector<1x8x1xf32> to vector<32x8x1xf32>
    %13 = arith.addf %9, %12 : vector<32x8x1xf32>
    %14 = arith.negf %13 : vector<32x8x1xf32>
    %15 = math.exp %14 : vector<32x8x1xf32>
    %cst_8 = arith.constant 1.000000e+00 : f32
    %16 = vector.broadcast %cst_8 : f32 to vector<32x8x1xf32>
    %17 = arith.addf %16, %15 : vector<32x8x1xf32>
    %18 = arith.divf %16, %17 : vector<32x8x1xf32>
    %19 = vector.broadcast %18 : vector<32x8x1xf32> to vector<32x8x32xf32>
    %20 = arith.mulf %0, %19 : vector<32x8x32xf32>
    %21 = vector.shape_cast %20 : vector<32x8x32xf32> to vector<256x32xf32>
    %c0_9 = arith.constant 0 : index
    %c0_10 = arith.constant 0 : index
    %22 = vector.load %arg5[%c0_9, %c0_10] : memref<32x32xf32, #tpu.memory_space<vmem>>, vector<32x32xf32>
    %cst_11 = arith.constant dense<0.000000e+00> : vector<256x32xf32>
    %23 = tpu.matmul %21, %22, %cst_11 {dimension_numbers = #tpu.dot_dimension_numbers<[1], [0], [0], [1], [0, 0, 1, 1], [], []>} : vector<256x32xf32>, vector<32x32xf32>, vector<256x32xf32> -> vector<256x32xf32>
    %24 = vector.shape_cast %23 : vector<256x32xf32> to vector<32x8x32xf32>
    %c0_12 = arith.constant 0 : index
    %c0_13 = arith.constant 0 : index
    %25 = vector.load %arg6[%c0_12, %c0_13] : memref<32x32xf32, #tpu.memory_space<vmem>>, vector<32x32xf32>
    %cst_14 = arith.constant dense<0.000000e+00> : vector<32x32xf32>
    %26 = tpu.matmul %1, %25, %cst_14 {dimension_numbers = #tpu.dot_dimension_numbers<[1], [0], [0], [1], [0, 0, 1, 1], [], []>} : vector<32x32xf32>, vector<32x32xf32>, vector<32x32xf32> -> vector<32x32xf32>
    %27 = vector.shape_cast %26 : vector<32x32xf32> to vector<32x1x32xf32>
    %28 = vector.broadcast %27 : vector<32x1x32xf32> to vector<32x8x32xf32>
    %29 = arith.addf %24, %28 : vector<32x8x32xf32>
    %c0_15 = arith.constant 0 : index
    %c0_16 = arith.constant 0 : index
    %30 = vector.load %arg7[%c0_15, %c0_16] : memref<1x32xf32, #tpu.memory_space<vmem>>, vector<1x32xf32>
    %31 = vector.shape_cast %30 : vector<1x32xf32> to vector<1x1x32xf32>
    %32 = vector.broadcast %31 : vector<1x1x32xf32> to vector<32x8x32xf32>
    %33 = arith.addf %29, %32 : vector<32x8x32xf32>
    %cst_17 = arith.constant dense<0.000000e+00> : vector<32x8xf32>
    %34 = vector.multi_reduction <add>, %33, %cst_17 [2] : vector<32x8x32xf32> to vector<32x8xf32>
    %35 = vector.shape_cast %34 : vector<32x8xf32> to vector<32x8x1xf32>
    %cst_18 = arith.constant 3.200000e+01 : f32
    %36 = vector.broadcast %cst_18 : f32 to vector<32x8x1xf32>
    %37 = arith.divf %35, %36 : vector<32x8x1xf32>
    %38 = vector.broadcast %37 : vector<32x8x1xf32> to vector<32x8x32xf32>
    %39 = arith.subf %33, %38 : vector<32x8x32xf32>
    %40 = arith.mulf %39, %39 : vector<32x8x32xf32>
    %cst_19 = arith.constant dense<0.000000e+00> : vector<32x8xf32>
    %41 = vector.multi_reduction <add>, %40, %cst_19 [2] : vector<32x8x32xf32> to vector<32x8xf32>
    %42 = vector.shape_cast %41 : vector<32x8xf32> to vector<32x8x1xf32>
    %cst_20 = arith.constant 3.200000e+01 : f32
    %43 = vector.broadcast %cst_20 : f32 to vector<32x8x1xf32>
    %44 = arith.divf %42, %43 : vector<32x8x1xf32>
    %45 = vector.broadcast %37 : vector<32x8x1xf32> to vector<32x8x32xf32>
    %46 = arith.subf %33, %45 : vector<32x8x32xf32>
    %cst_21 = arith.constant 9.99999974E-6 : f32
    %47 = vector.broadcast %cst_21 : f32 to vector<32x8x1xf32>
    %48 = arith.addf %44, %47 : vector<32x8x1xf32>
    %49 = math.rsqrt %48 : vector<32x8x1xf32>
    %50 = vector.broadcast %49 : vector<32x8x1xf32> to vector<32x8x32xf32>
    %51 = arith.mulf %46, %50 : vector<32x8x32xf32>
    %c0_22 = arith.constant 0 : index
    %c0_23 = arith.constant 0 : index
    %52 = vector.load %arg8[%c0_22, %c0_23] : memref<1x32xf32, #tpu.memory_space<vmem>>, vector<1x32xf32>
    %53 = vector.shape_cast %52 : vector<1x32xf32> to vector<1x1x32xf32>
    %54 = vector.broadcast %53 : vector<1x1x32xf32> to vector<32x8x32xf32>
    %55 = arith.mulf %51, %54 : vector<32x8x32xf32>
    %c0_24 = arith.constant 0 : index
    %c0_25 = arith.constant 0 : index
    %56 = vector.load %arg9[%c0_24, %c0_25] : memref<1x32xf32, #tpu.memory_space<vmem>>, vector<1x32xf32>
    %57 = vector.shape_cast %56 : vector<1x32xf32> to vector<1x1x32xf32>
    %58 = vector.broadcast %57 : vector<1x1x32xf32> to vector<32x8x32xf32>
    %59 = arith.addf %55, %58 : vector<32x8x32xf32>
    %cst_26 = arith.constant 0.000000e+00 : f32
    %60 = vector.broadcast %cst_26 : f32 to vector<32x8x32xf32>
    %61 = arith.maximumf %59, %60 : vector<32x8x32xf32>
    %c0_27 = arith.constant 0 : index
    %c0_28 = arith.constant 0 : index
    %62 = vector.load %arg10[%c0_27, %c0_28] : memref<1x32xf32, #tpu.memory_space<vmem>>, vector<1x32xf32>
    %63 = vector.shape_cast %62 : vector<1x32xf32> to vector<1x1x32xf32>
    %64 = vector.broadcast %63 : vector<1x1x32xf32> to vector<32x8x32xf32>
    %65 = arith.mulf %61, %64 : vector<32x8x32xf32>
    %cst_29 = arith.constant dense<0.000000e+00> : vector<32x8xf32>
    %66 = vector.multi_reduction <add>, %65, %cst_29 [2] : vector<32x8x32xf32> to vector<32x8xf32>
    %67 = vector.shape_cast %66 : vector<32x8xf32> to vector<32x8x1xf32>
    %c0_30 = arith.constant 0 : index
    %68 = memref.load %arg11[%c0_30] : memref<1xf32, #tpu.memory_space<smem>>
    %69 = vector.broadcast %68 : f32 to vector<32x8x1xf32>
    %70 = arith.addf %67, %69 : vector<32x8x1xf32>
    %c0_31 = arith.constant 0 : index
    %c0_32 = arith.constant 0 : index
    %c0_33 = arith.constant 0 : index
    %71 = vector.load %arg12[%c0_31, %c0_32, %c0_33] : memref<32x8x1xf32, #tpu.memory_space<vmem>>, vector<32x8x1xf32>
    tpu.vector_store %arg12[%c0_31, %c0_32, %c0_33], %70 {strides = array<i32>} : memref<32x8x1xf32, #tpu.memory_space<vmem>>, vector<32x8x1xf32>,
    return
  }
  func.func @transform_0(%arg0: i32) -> (i32, i32, i32) {
    %c0_i32 = arith.constant 0 : i32
    %c0_i32_0 = arith.constant 0 : i32
    %c0_i32_1 = arith.constant 0 : i32
    return %arg0, %c0_i32, %c0_i32_0 : i32, i32, i32
  }
  func.func @transform_1(%arg0: i32) -> (i32, i32) {
    %c0_i32 = arith.constant 0 : i32
    %c0_i32_0 = arith.constant 0 : i32
    return %arg0, %c0_i32 : i32, i32
  }
  func.func @transform_2(%arg0: i32) -> (i32, i32) {
    %c0_i32 = arith.constant 0 : i32
    %c0_i32_0 = arith.constant 0 : i32
    %c0_i32_1 = arith.constant 0 : i32
    return %c0_i32, %c0_i32_0 : i32, i32
  }
  func.func @transform_3(%arg0: i32) -> (i32, i32) {
    %c0_i32 = arith.constant 0 : i32
    %c0_i32_0 = arith.constant 0 : i32
    %c0_i32_1 = arith.constant 0 : i32
    return %c0_i32, %c0_i32_0 : i32, i32
  }
  func.func @transform_4(%arg0: i32) -> (i32, i32) {
    %c0_i32 = arith.constant 0 : i32
    %c0_i32_0 = arith.constant 0 : i32
    %c0_i32_1 = arith.constant 0 : i32
    return %c0_i32, %c0_i32_0 : i32, i32
  }
  func.func @transform_5(%arg0: i32) -> (i32, i32) {
    %c0_i32 = arith.constant 0 : i32
    %c0_i32_0 = arith.constant 0 : i32
    %c0_i32_1 = arith.constant 0 : i32
    return %c0_i32, %c0_i32_0 : i32, i32
  }
  func.func @transform_6(%arg0: i32) -> (i32, i32) {
    %c0_i32 = arith.constant 0 : i32
    %c0_i32_0 = arith.constant 0 : i32
    %c0_i32_1 = arith.constant 0 : i32
    return %c0_i32, %c0_i32_0 : i32, i32
  }
  func.func @transform_7(%arg0: i32) -> (i32, i32) {
    %c0_i32 = arith.constant 0 : i32
    %c0_i32_0 = arith.constant 0 : i32
    %c0_i32_1 = arith.constant 0 : i32
    return %c0_i32, %c0_i32_0 : i32, i32
  }
  func.func @transform_8(%arg0: i32) -> (i32, i32) {
    %c0_i32 = arith.constant 0 : i32
    %c0_i32_0 = arith.constant 0 : i32
    %c0_i32_1 = arith.constant 0 : i32
    return %c0_i32, %c0_i32_0 : i32, i32
  }
  func.func @transform_9(%arg0: i32) -> (i32, i32) {
    %c0_i32 = arith.constant 0 : i32
    %c0_i32_0 = arith.constant 0 : i32
    %c0_i32_1 = arith.constant 0 : i32
    return %c0_i32, %c0_i32_0 : i32, i32
  }
  func.func @transform_10(%arg0: i32) -> i32 {
    %c0_i32 = arith.constant 0 : i32
    %c0_i32_0 = arith.constant 0 : i32
    return %c0_i32 : i32
  }
  func.func @transform_11(%arg0: i32) -> (i32, i32, i32) {
    %c0_i32 = arith.constant 0 : i32
    %c0_i32_0 = arith.constant 0 : i32
    %c0_i32_1 = arith.constant 0 : i32
    return %arg0, %c0_i32, %c0_i32_0 : i32, i32, i32
  }
}

</mosaic_0001>

<bundles_post_ra>
// kernel: tpu_custom_call.1
= control target key start
LH: loop header
LB: loop body
LE: loop exit
PB: predicated region body
PF: predicated region fallthrough
CT: control target
= control target key end

     0   :  { %s3510_s19 = smov 0   ;;  %s4641_s0 = inlined_call_operand.vmem [shape: f32[64,8,32], index: 0, kind: input, shape index: {}]   ;;  %s4642_s1 = inlined_call_operand.vmem [shape: f32[64,32], index: 1, kind: input, shape index: {}]   ;;  %s4643_s2 = inlined_call_operand.vmem [shape: f32[8,32], index: 2, kind: input, shape index: {}]   ;;  %s4644_s3 = inlined_call_operand.vmem [shape: f32[8,1], index: 3, kind: input, shape index: {}]   ;;  %s4645_s4 = inlined_call_operand.vmem [shape: f32[32,32], index: 4, kind: input, shape index: {}]   ;;  %s4646_s5 = inlined_call_operand.vmem [shape: f32[32,32], index: 5, kind: input, shape index: {}]   ;;  %s4647_s6 = inlined_call_operand.vmem [shape: f32[1,32], index: 6, kind: input, shape index: {}]   ;;  %s4648_s7 = inlined_call_operand.vmem [shape: f32[1,32], index: 7, kind: input, shape index: {}]   ;;  %s4649_s8 = inlined_call_operand.vmem [shape: f32[1,32], index: 8, kind: input, shape index: {}]   ;;  %s4650_s9 = inlined_call_operand.vmem [shape: f32[1,32], index: 9, kind: input, shape index: {}]   ;;  %s4651_s10 = inlined_call_operand.<no memory space> [shape: f32[1], index: 10, kind: input, shape index: {}]   ;;  %s4652_s11 = inlined_call_operand.vmem [shape: f32[64,8,1], index: 11, kind: output, shape index: {}]  }
   0x1   :  { %16 = sst [smem:[#allocation2]] %s4651_s10 }
   0x2 LB: > { %s3006_s20 = sadd.s32 4294967295, %s3443_s19   ;;  %p3010_p0 = scmp.ge.s32.totalorder %s3443_s19, 1  ;;  %s3443_s19 = sphi %s3510_s19, %s22_s19  }
   0x3   : > { %p350_p1 = scmp.lt.s32.totalorder %s3443_s19, 3 }
   0x5   : > { %p351_p2 = pnand %p3010_p0, %p350_p1 }
   0x6   : > { %s3013_s21 = sshll.u32 (!%p351_p2), %s3006_s20, 2  ;;  %v457_v0 = vlaneseq (!%p351_p2)  ;;  %v3445_v1 = vmov (!%p351_p2), 1966171168   ;;  %v3544_v18 = vld [vmem:[%s4643_s2] sm:$0xff] (!%p351_p2)  ;;  %vm842_vm0 = vcmask (!%p351_p2), 261120   ;;  %s3011_s23 = sshll.u32 (!%p351_p2), %s3006_s20, 5 }
   0x7   : > { %354 = sbr.rel (%p351_p2) target bundleno = 1145 (0x479), region = 64  ;;  %p402_p3 = scmp.lt.s32.totalorder (!%p351_p2), %s3013_s21, 7  ;;  %v455_v2 = vunpack.c.l.s4 (!%p351_p2), %v3445_v1  ;;  %vm2905_vm1 = vcmask (!%p351_p2), 7168  }
   0x8   : > { %v458_v3 = vshrl.u32 (!%p351_p2), %v457_v0, 7  ;;  %p396_p4 = scmp.lt.s32.totalorder (!%p351_p2), %s3011_s23, 63 }
   0x9   : > { %v456_v4 = vunpack.c.0.s8 (!%p351_p2), %v455_v2 }
   0xa   : > { %v3528_v7 = vsub.s32 (!%p351_p2), 0, %v458_v3 }
   0xb   : > { %v3520_v5 = vsub.s32 (!%p351_p2), %v456_v4, %v458_v3 }
   0xe   : > { %s4654_s21 = smov (!%p402_p3, %s3013_s21), 7  ;;  %s4656_s23 = smov (!%p396_p4, %s3011_s23), 63 }
   0xf   : > { %s3014_s10 = sshll.u32 %s4654_s21, 3  ;;  %s3012_s25 = sshll.u32 %s4656_s23, 3 }
  0x10   : > { %s3525_s24 = scalar_lea.vmem %s4642_s1, %s3014_s10  ;;  %s3741_s28 = scalar_lea.vmem %s4641_s0, %s3012_s25 }
  0x11   : > { %v448_v6 = vld [vmem:[%s3525_s24 + $0x18] sm:$0xff]  ;;  %v3531_v8 = vld [vmem:[%s3525_s24] sm:$0xff]  ;;  %v447_v9 = vld [vmem:[%s3525_s24 + $0x10] sm:$0xff]  ;;  %s2871_s10 = sld [smem:[#allocation2]]  ;;  %s4540_s27 = scalar_lea.vmem %s4652_s11, %s3012_s25 }
  0x12   : > { %v607_v10 = vrot.slane %v448_v6, %v3520_v5  ;;  %v460_v11 = vrot.slane %v3531_v8, %v3520_v5  ;;  %v551_v12 = vcombine.high %v447_v9, %v447_v9  ;;  %v558_v13 = vrot.slane %v447_v9, %v3520_v5 }
  0x13   : > { %v600_v50 = vcombine.high %v448_v6, %v448_v6  ;;  %v453_v61 = vcombine.high %v3531_v8, %v3531_v8 }
  0x14   : > { %v623_v14 = vrot.slane %v607_v10, %v3520_v5  ;;  %v476_v15 = vrot.slane %v460_v11, %v3520_v5  ;;  %v565_v16 = vrot.slane %v551_v12, %v3520_v5  ;;  %v615_v17 = vcombine.high %v607_v10, %v607_v10 }
  0x15   : > { %v3547_v19 = vrot.slane %v558_v13, %v3520_v5  ;;  %v468_v20 = vcombine.high %v460_v11, %v460_v11  ;;  %v566_v35 = vcombine.high %v558_v13, %v558_v13  ;;  %v614_v60 = vrot.slane %v600_v50, %v3520_v5 }
  0x16   : > { %v749_v21 = vrot.slane %v623_v14, %v3528_v7  ;;  %v653_v22 = vrot.slane %v476_v15, %v3528_v7  ;;  %v581_v23 = vrot.slane %v565_v16, %v3520_v5  ;;  %v637_v24 = vrot.slane %v615_v17, %v3520_v5 }
  0x17   : > { %v596_v25 = vcombine.high %v3547_v19, %v3547_v19  ;;  %v645_v26 = vcombine.high %v623_v14, %v623_v14  ;;  %v490_v27 = vrot.slane %v468_v20, %v3520_v5  ;;  %v567_v28 = vcombine.high %v565_v16, %v565_v16 }
  0x18   : > { %v834_v29 = vmul.f32 %v749_v21, %v3544_v18  ;;  %v810_v30 = vmul.f32 %v653_v22, %v3544_v18  ;;  %v733_v31 = vrot.slane %v581_v23, %v3528_v7  ;;  %v753_v32 = vrot.slane %v637_v24, %v3528_v7 }
  0x19   : > { %v725_v33 = vrot.slane %v596_v25, %v3528_v7  ;;  %v657_v34 = vrot.slane %v490_v27, %v3528_v7  ;;  %v757_v39 = vrot.slane %v645_v26, %v3528_v7  ;;  %v595_v41 = vrot.slane %v567_v28, %v3520_v5 }
  0x1a   : > { %v915_v36 = vsel %vm842_vm0, %v834_v29, 0.0  ;;  %v843_v37 = vsel %vm842_vm0, %v810_v30, 0.0  ;;  %v830_v38 = vmul.f32 %v733_v31, %v3544_v18  ;;  %v835_v43 = vmul.f32 %v753_v32, %v3544_v18 }
  0x1b   : > { %916 = vadd.xlane.f32.xlu1 %v915_v36  ;;  %844 = vadd.xlane.f32.xlu0 %v843_v37  ;;  %v828_v40 = vmul.f32 %v725_v33, %v3544_v18  ;;  %v811_v44 = vmul.f32 %v657_v34, %v3544_v18  ;;  %v498_v45 = vcombine.high %v476_v15, %v476_v15 }
  0x1c   : > { %v903_v42 = vsel %vm842_vm0, %v830_v38, 0.0  ;;  %v836_v47 = vmul.f32 %v757_v39, %v3544_v18  ;;  %v3575_v49 = vrot.slane %v566_v35, %v3520_v5  ;;  %v737_v51 = vrot.slane %v595_v41, %v3528_v7 }
  0x1d   : > { %v897_v46 = vsel %vm842_vm0, %v828_v40, 0.0  ;;  %v661_v48 = vrot.slane %v498_v45, %v3528_v7  ;;  %v599_v52 = vcombine.high %v595_v41, %v595_v41  ;;  %v597_v53 = vcombine.high %v581_v23, %v581_v23 }
  0x1e   : > { %v918_v54 = vsel %vm842_vm0, %v835_v43, 0.0  ;;  %v846_v55 = vsel %vm842_vm0, %v811_v44, 0.0  ;;  %v598_v57 = vcombine.high %v3575_v49, %v3575_v49  ;;  %v647_v59 = vcombine.high %v637_v24, %v637_v24  ;;  %v446_v24 = vld [vmem:[%s3525_s24 + $0x8] sm:$0xff] }
  0x1f   : > { %904 = vadd.xlane.f32.xlu1 %v903_v42  ;;  %898 = vadd.xlane.f32.xlu0 %v897_v46  ;;  %v812_v56 = vmul.f32 %v661_v48, %v3544_v18  ;;  %v831_v62 = vmul.f32 %v737_v51, %v3544_v18  ;;  %v745_v63 = vrot.slane %v599_v52, %v3528_v7  ;;  %v921_v1 = vsel %vm842_vm0, %v836_v47, 0.0 }
  0x20   : > { %v729_v58 = vrot.slane %v598_v57, %v3528_v7  ;;  %v741_v0 = vrot.slane %v597_v53, %v3528_v7  ;;  %v500_v4 = vcombine.high %v490_v27, %v490_v27  ;;  %v761_v6 = vrot.slane %v647_v59, %v3528_v7 }
  0x21   : > { %v849_v2 = vsel %vm842_vm0, %v812_v56, 0.0  ;;  %v630_v9 = vrot.slane %v614_v60, %v3520_v5  ;;  %v467_v8 = vrot.slane %v453_v61, %v3520_v5  ;;  %v906_v10 = vsel %vm842_vm0, %v831_v62, 0.0 }
  0x22   : > { %v829_v3 = vmul.f32 %v729_v58, %v3544_v18  ;;  %v833_v11 = vmul.f32 %v745_v63, %v3544_v18  ;;  %v832_v12 = vmul.f32 %v741_v0, %v3544_v18  ;;  %v616_v13 = vcombine.high %v614_v60, %v614_v60 }
  0x23   : > { %919 = vadd.xlane.f32.xlu1 %v918_v54  ;;  %847 = vadd.xlane.f32.xlu0 %v846_v55  ;;  %v665_v15 = vrot.slane %v500_v4, %v3528_v7  ;;  %v483_v16 = vrot.slane %v467_v8, %v3520_v5  ;;  %v469_v17 = vcombine.high %v467_v8, %v467_v8 }
  0x24   : > { %v900_v14 = vsel %vm842_vm0, %v829_v3, 0.0  ;;  %v912_v20 = vsel %vm842_vm0, %v833_v11, 0.0  ;;  %v837_v21 = vmul.f32 %v761_v6, %v3544_v18  ;;  %v765_v22 = vrot.slane %v630_v9, %v3528_v7 }
  0x25   : > { %v644_v23 = vrot.slane %v616_v13, %v3520_v5  ;;  %v909_v25 = vsel %vm842_vm0, %v832_v12, 0.0  ;;  %v813_v26 = vmul.f32 %v665_v15, %v3544_v18  ;;  %v669_v27 = vrot.slane %v483_v16, %v3528_v7 }
  0x26   : > { %v497_v28 = vrot.slane %v469_v17, %v3520_v5  ;;  %v509_v29 = vrot.slane %v446_v24, %v3520_v5  ;;  %v924_v30 = vsel %vm842_vm0, %v837_v21, 0.0  ;;  %v838_v31 = vmul.f32 %v765_v22, %v3544_v18 }
  0x27   : > { %922 = vadd.xlane.f32.xlu1 %v921_v1  ;;  %850 = vadd.xlane.f32.xlu0 %v849_v2  ;;  %v769_v32 = vrot.slane %v644_v23, %v3528_v7  ;;  %v646_v33 = vcombine.high %v630_v9, %v630_v9  ;;  %v852_v34 = vsel %vm842_vm0, %v813_v26, 0.0  ;;  %v814_v35 = vmul.f32 %v669_v27, %v3544_v18 }
  0x28   : > { %v673_v36 = vrot.slane %v497_v28, %v3528_v7  ;;  %v499_v37 = vcombine.high %v483_v16, %v483_v16  ;;  %v648_v38 = vcombine.high %v644_v23, %v644_v23  ;;  %v517_v39 = vcombine.high %v509_v29, %v509_v29 }
  0x29   : > { %v927_v40 = vsel %vm842_vm0, %v838_v31, 0.0  ;;  %v839_v41 = vmul.f32 %v769_v32, %v3544_v18  ;;  %v773_v42 = vrot.slane %v646_v33, %v3528_v7  ;;  %v502_v43 = vcombine.high %v446_v24, %v446_v24 }
  0x2a   : > { %v855_v44 = vsel %vm842_vm0, %v814_v35, 0.0  ;;  %v815_v45 = vmul.f32 %v673_v36, %v3544_v18  ;;  %v677_v46 = vrot.slane %v499_v37, %v3528_v7  ;;  %v501_v47 = vcombine.high %v497_v28, %v497_v28 }
  0x2b   : > { %907 = vadd.xlane.f32.xlu1 %v906_v10  ;;  %901 = vadd.xlane.f32.xlu0 %v900_v14  ;;  %v777_v48 = vrot.slane %v648_v38, %v3528_v7  ;;  %v539_v50 = vrot.slane %v517_v39, %v3520_v5  ;;  %v840_v51 = vmul.f32 %v773_v42, %v3544_v18  ;;  %v930_v54 = vsel %vm842_vm0, %v839_v41, 0.0 }
  0x2c   : > { %v516_v52 = vrot.slane %v502_v43, %v3520_v5  ;;  %v525_v53 = vrot.slane %v509_v29, %v3520_v5  ;;  %v858_v55 = vsel %vm842_vm0, %v815_v45, 0.0  ;;  %v816_v56 = vmul.f32 %v677_v46, %v3544_v18 }
  0x2d   : > { %v681_v57 = vrot.slane %v501_v47, %v3528_v7  ;;  %v841_v58 = vmul.f32 %v777_v48, %v3544_v18  ;;  %v689_v59 = vrot.slane %v539_v50, %v3528_v7  ;;  %v549_v60 = vcombine.high %v539_v50, %v539_v50 }
  0x2e   : > { %v518_v61 = vcombine.high %v516_v52, %v516_v52  ;;  %v685_v62 = vrot.slane %v525_v53, %v3528_v7  ;;  %v933_v63 = vsel %vm842_vm0, %v840_v51, 0.0  ;;  %v861_v0 = vsel %vm842_vm0, %v816_v56, 0.0 }
  0x2f   : > { %913 = vadd.xlane.f32.xlu1 %v912_v20  ;;  %910 = vadd.xlane.f32.xlu0 %v909_v25  ;;  %v817_v1 = vmul.f32 %v681_v57, %v3544_v18  ;;  %v547_v2 = vcombine.high %v525_v53, %v525_v53  ;;  %v819_v3 = vmul.f32 %v689_v59, %v3544_v18  ;;  %v936_v8 = vsel %vm842_vm0, %v841_v58, 0.0 }
  0x30   : > { %v697_v4 = vrot.slane %v549_v60, %v3528_v7  ;;  %v546_v6 = vrot.slane %v518_v61, %v3520_v5  ;;  %v818_v9 = vmul.f32 %v685_v62, %v3544_v18  ;;  %v532_v12 = vrot.slane %v516_v52, %v3520_v5 }
  0x31   : > { %v864_v10 = vsel %vm842_vm0, %v817_v1, 0.0  ;;  %v693_v11 = vrot.slane %v547_v2, %v3528_v7  ;;  %v870_v13 = vsel %vm842_vm0, %v819_v3, 0.0  ;;  %v3446_v23 = vmov 0  }
  0x32   : > { %v821_v14 = vmul.f32 %v697_v4, %v3544_v18  ;;  %v705_v15 = vrot.slane %v546_v6, %v3528_v7  ;;  %v550_v16 = vcombine.high %v546_v6, %v546_v6  ;;  %v867_v17 = vsel %vm842_vm0, %v818_v9, 0.0  ;;  %3235 = vset.pattern.permute.xlu1 %v3446_v23  ;;  %3236 = vset.pattern.permute.xlu0 %v3446_v23 }
  0x33   : > { %925 = vadd.xlane.f32.xlu1 %v924_v30  ;;  %853 = vadd.xlane.f32.xlu0 %v852_v34  ;;  %v820_v20 = vmul.f32 %v693_v11, %v3544_v18  ;;  %v701_v21 = vrot.slane %v532_v12, %v3528_v7  ;;  %v548_v22 = vcombine.high %v532_v12, %v532_v12 }
  0x34   : > { %v876_v24 = vsel %vm842_vm0, %v821_v14, 0.0  ;;  %v823_v25 = vmul.f32 %v705_v15, %v3544_v18  ;;  %v713_v26 = vrot.slane %v550_v16, %v3528_v7  ;;  %v721_v31 = vrot.slane %v3575_v49, %v3528_v7 }
  0x35   : > { %v873_v27 = vsel %vm842_vm0, %v820_v20, 0.0  ;;  %v822_v28 = vmul.f32 %v701_v21, %v3544_v18  ;;  %v709_v29 = vrot.slane %v548_v22, %v3528_v7  ;;  %v717_v35 = vrot.slane %v3547_v19, %v3528_v7  ;;  %v3676_v19 = vld [vmem:[%s4644_s3] sm:$0xff] }
  0x36   : > { %v882_v30 = vsel %vm842_vm0, %v823_v25, 0.0  ;;  %v825_v32 = vmul.f32 %v713_v26, %v3544_v18  ;;  %v827_v37 = vmul.f32 %v721_v31, %v3544_v18 }
  0x37   : > { %928 = vadd.xlane.f32.xlu1 %v927_v40  ;;  %856 = vadd.xlane.f32.xlu0 %v855_v44  ;;  %v879_v33 = vsel %vm842_vm0, %v822_v28, 0.0  ;;  %v824_v34 = vmul.f32 %v709_v29, %v3544_v18  ;;  %v826_v49 = vmul.f32 %v717_v35, %v3544_v18 }
  0x38   : > { %v888_v36 = vsel %vm842_vm0, %v825_v32, 0.0  ;;  %v894_v39 = vsel %vm842_vm0, %v827_v37, 0.0 }
  0x39   : > { %v885_v38 = vsel %vm842_vm0, %v824_v34, 0.0  ;;  %v891_v40 = vsel %vm842_vm0, %v826_v49, 0.0 }
  0x3b   : > { %931 = vadd.xlane.f32.xlu1 %v930_v54  ;;  %859 = vadd.xlane.f32.xlu0 %v858_v55 }
  0x3f   : > { %934 = vadd.xlane.f32.xlu1 %v933_v63  ;;  %862 = vadd.xlane.f32.xlu0 %v861_v0 }
  0x43   : > { %937 = vadd.xlane.f32.xlu1 %v936_v8  ;;  %865 = vadd.xlane.f32.xlu0 %v864_v10 }
  0x47   : > { %871 = vadd.xlane.f32.xlu1 %v870_v13  ;;  %868 = vadd.xlane.f32.xlu0 %v867_v17 }
  0x4b   : > { %877 = vadd.xlane.f32.xlu1 %v876_v24  ;;  %874 = vadd.xlane.f32.xlu0 %v873_v27 }
  0x4f   : > { %883 = vadd.xlane.f32.xlu1 %v882_v30  ;;  %880 = vadd.xlane.f32.xlu0 %v879_v33 }
  0x53   : > { %889 = vadd.xlane.f32.xlu1 %v888_v36  ;;  %886 = vadd.xlane.f32.xlu0 %v885_v38 }
  0x57   : > { %895 = vadd.xlane.f32.xlu1 %v894_v39  ;;  %892 = vadd.xlane.f32.xlu0 %v891_v40 }
  0xa8   : > { %v917_v41 = vpop.xlane.xlu1 %916  ;;  %v845_v42 = vpop.xlane.xlu0 %844 }
  0xa9   : > { %v964_v43 = vadd.f32 %v3676_v19, %v917_v41  ;;  %v940_v44 = vadd.f32 %v3676_v19, %v845_v42 }
  0xab   : > { %v3041_v18 = vmul.f32 -1.442695, %v964_v43  ;;  %v3017_v45 = vmul.f32 -1.442695, %v940_v44 }
  0xac   : > { %v905_v46 = vpop.xlane.xlu1 %904  ;;  %v899_v47 = vpop.xlane.xlu0 %898 }
  0xad   : > { %3241 = vpow2.f32 %v3041_v18  ;;  %v960_v48 = vadd.f32 %v3676_v19, %v905_v46  ;;  %v958_v50 = vadd.f32 %v3676_v19, %v899_v47 }
  0xae   : > { %3243 = vpow2.f32 %v3017_v45 }
  0xaf   : > { %v3037_v51 = vmul.f32 -1.442695, %v960_v48  ;;  %v3035_v52 = vmul.f32 -1.442695, %v958_v50 }
  0xb0   : > { %v920_v53 = vpop.xlane.xlu1 %919  ;;  %v848_v54 = vpop.xlane.xlu0 %847 }
  0xb1   : > { %3245 = vpow2.f32 %v3037_v51  ;;  %v965_v55 = vadd.f32 %v3676_v19, %v920_v53  ;;  %v941_v56 = vadd.f32 %v3676_v19, %v848_v54  ;;  %v1356_v54 = vld [vmem:[%s4645_s4] sm:$0xff] }
  0xb2   : > { %3247 = vpow2.f32 %v3035_v52 }
  0xb3   : > { %v3042_v57 = vmul.f32 -1.442695, %v965_v55  ;;  %v3018_v58 = vmul.f32 -1.442695, %v941_v56  ;;  %v1357_v55 = vld [vmem:[%s4645_s4 + $0x8] sm:$0xff] }
  0xb4   : > { %v923_v59 = vpop.xlane.xlu1 %922  ;;  %v851_v60 = vpop.xlane.xlu0 %850 }
  0xb5   : > { %3249 = vpow2.f32 %v3042_v57  ;;  %v966_v61 = vadd.f32 %v3676_v19, %v923_v59  ;;  %v942_v62 = vadd.f32 %v3676_v19, %v851_v60 }
  0xb6   : > { %3251 = vpow2.f32 %v3018_v58 }
  0xb7   : > { %v3242_v63 = vpop.eup %3241  ;;  %v3043_v0 = vmul.f32 -1.442695, %v966_v61  ;;  %v3019_v4 = vmul.f32 -1.442695, %v942_v62 }
  0xb8   : > { %v3244_v1 = vpop.eup %3243  ;;  %v1092_v2 = vadd.f32 1.0, %v3242_v63  ;;  %v908_v3 = vpop.xlane.xlu1 %907  ;;  %v3205_v63 = vpack.c.bf16 %v1357_v55, %v1356_v54 }
  0xb9   : > { %v902_v6 = vpop.xlane.xlu0 %901  ;;  %v1068_v9 = vadd.f32 1.0, %v3244_v1  ;;  %3253 = vpow2.f32 %v3043_v0  ;;  %v961_v8 = vadd.f32 %v3676_v19, %v908_v3 }
  0xba   : > { %v959_v10 = vadd.f32 %v3676_v19, %v902_v6  ;;  %3255 = vrcp.f32 %v1092_v2  ;;  %v1358_v6 = vld [vmem:[%s4645_s4 + $0x10] sm:$0xff]  ;;  %3206 = vmatprep.subr.bf16.mxu0 %v3205_v63  ;;  %3221 = vmatprep.subr.bf16.mxu1 %v3205_v63 }
  0xbb   : > { %v3246_v11 = vpop.eup %3245  ;;  %3257 = vrcp.f32 %v1068_v9  ;;  %v3038_v12 = vmul.f32 -1.442695, %v961_v8  ;;  %v1359_v9 = vld [vmem:[%s4645_s4 + $0x18] sm:$0xff]  ;;  %3208 = vmatpush3.bf16.msra.mxu0 %v3205_v63  ;;  %3223 = vmatpush3.bf16.msra.mxu1 %v3205_v63 }
  0xbc   : > { %v3248_v13 = vpop.eup %3247  ;;  %v1088_v14 = vadd.f32 1.0, %v3246_v11  ;;  %3259 = vpow2.f32 %v3019_v4  ;;  %v914_v15 = vpop.xlane.xlu1 %913  ;;  %v3036_v16 = vmul.f32 -1.442695, %v959_v10 }
  0xbd   : > { %v911_v17 = vpop.xlane.xlu0 %910  ;;  %v1086_v20 = vadd.f32 1.0, %v3248_v13  ;;  %3261 = vpow2.f32 %v3038_v12  ;;  %v963_v21 = vadd.f32 %v3676_v19, %v914_v15 }
  0xbe   : > { %v962_v22 = vadd.f32 %v3676_v19, %v911_v17  ;;  %3263 = vrcp.f32 %v1088_v14 }
  0xbf   : > { %v3250_v23 = vpop.eup %3249  ;;  %3265 = vrcp.f32 %v1086_v20  ;;  %v3040_v24 = vmul.f32 -1.442695, %v963_v21 }
  0xc0   : > { %v3252_v25 = vpop.eup %3251  ;;  %v1093_v26 = vadd.f32 1.0, %v3250_v23  ;;  %3267 = vpow2.f32 %v3036_v16  ;;  %v926_v27 = vpop.xlane.xlu1 %925  ;;  %v3039_v28 = vmul.f32 -1.442695, %v962_v22  ;;  %v3209_v16 = vpack.c.bf16 %v1359_v9, %v1358_v6  ;;  %v1681_v6 = vld [vmem:[%s4646_s5] sm:$0xff]  ;;  %v1682_v9 = vld [vmem:[%s4646_s5 + $0x8] sm:$0xff] }
  0xc1   : > { %v854_v29 = vpop.xlane.xlu0 %853  ;;  %v1069_v30 = vadd.f32 1.0, %v3252_v25  ;;  %3269 = vpow2.f32 %v3040_v24  ;;  %v967_v31 = vadd.f32 %v3676_v19, %v926_v27 }
  0xc2   : > { %v943_v32 = vadd.f32 %v3676_v19, %v854_v29  ;;  %3271 = vrcp.f32 %v1093_v26  ;;  %3210 = vmatprep.subr.bf16.mxu0 %v3209_v16  ;;  %3222 = vmatprep.subr.bf16.mxu1 %v3209_v16 }
  0xc3   : > { %v3254_v33 = vpop.eup %3253  ;;  %3273 = vrcp.f32 %v1069_v30  ;;  %v3044_v34 = vmul.f32 -1.442695, %v967_v31  ;;  %3212 = vmatpush3.bf16.msra.mxu0 %v3209_v16  ;;  %3224 = vmatpush3.bf16.msra.mxu1 %v3209_v16 }
  0xc4   : > { %v3256_v35 = vpop.eup %3255  ;;  %v1094_v36 = vadd.f32 1.0, %v3254_v33  ;;  %v929_v37 = vpop.xlane.xlu1 %928  ;;  %3275 = vpow2.f32 %v3039_v28  ;;  %v3020_v38 = vmul.f32 -1.442695, %v943_v32 }
  0xc5   : > { %v857_v49 = vpop.xlane.xlu0 %856  ;;  %v3258_v39 = vpop.eup %3257  ;;  %3277 = vpow2.f32 %v3044_v34  ;;  %v968_v40 = vadd.f32 %v3676_v19, %v929_v37 }
  0xc6   : > { %v944_v41 = vadd.f32 %v3676_v19, %v857_v49  ;;  %v3260_v42 = vpop.eup %3259  ;;  %3279 = vrcp.f32 %v1094_v36  ;;  %1166 = vperm.xlu1 %3235, %v3258_v39  }
  0xc7   : > { %v3262_v43 = vpop.eup %3261  ;;  %v1070_v44 = vadd.f32 1.0, %v3260_v42  ;;  %v3045_v18 = vmul.f32 -1.442695, %v968_v40  ;;  %3281 = vpow2.f32 %v3020_v38 }
  0xc8   : > { %v3264_v45 = vpop.eup %3263  ;;  %v932_v46 = vpop.xlane.xlu1 %931  ;;  %v3021_v47 = vmul.f32 -1.442695, %v944_v41  ;;  %v1089_v60 = vadd.f32 1.0, %v3262_v43 }
  0xc9   : > { %v860_v48 = vpop.xlane.xlu0 %859  ;;  %v3266_v50 = vpop.eup %3265  ;;  %3283 = vrcp.f32 %v1070_v44  ;;  %v969_v51 = vadd.f32 %v3676_v19, %v932_v46 }
  0xca   : > { %v945_v52 = vadd.f32 %v3676_v19, %v860_v48  ;;  %v3268_v53 = vpop.eup %3267  ;;  %1286 = vperm.xlu1 %3235, %v3256_v35   ;;  %1256 = vperm.xlu0 %3236, %v3266_v50   ;;  %3285 = vpow2.f32 %v3045_v18 }
  0xcb   : > { %v3270_v56 = vpop.eup %3269  ;;  %v1087_v57 = vadd.f32 1.0, %v3268_v53  ;;  %v3046_v58 = vmul.f32 -1.442695, %v969_v51  ;;  %3287 = vpow2.f32 %v3021_v47 }
  0xcc   : > { %v3272_v59 = vpop.eup %3271  ;;  %v935_v61 = vpop.xlane.xlu1 %934  ;;  %v3022_v2 = vmul.f32 -1.442695, %v945_v52  ;;  %v1091_v23 = vadd.f32 1.0, %v3270_v56 }
  0xcd   : > { %v863_v62 = vpop.xlane.xlu0 %862  ;;  %v3274_v0 = vpop.eup %3273  ;;  %3289 = vrcp.f32 %v1087_v57  ;;  %v970_v1 = vadd.f32 %v3676_v19, %v935_v61 }
  0xce   : > { %v3276_v3 = vpop.eup %3275  ;;  %1266 = vperm.xlu1 %3235, %v3264_v45   ;;  %1291 = vperm.xlu0 %3236, %v3272_v59   ;;  %v946_v4 = vadd.f32 %v3676_v19, %v863_v62  ;;  %3291 = vpow2.f32 %v3046_v58 }
  0xcf   : > { %v3278_v8 = vpop.eup %3277  ;;  %v3047_v10 = vmul.f32 -1.442695, %v970_v1  ;;  %3293 = vrcp.f32 %v1089_v60  ;;  %v1090_v13 = vadd.f32 1.0, %v3276_v3 }
  0xd0   : > { %v3280_v11 = vpop.eup %3279  ;;  %v1095_v12 = vadd.f32 1.0, %v3278_v8  ;;  %v938_v14 = vpop.xlane.xlu1 %937  ;;  %3295 = vpow2.f32 %v3022_v2  ;;  %v3023_v21 = vmul.f32 -1.442695, %v946_v4 }
  0xd1   : > { %v866_v15 = vpop.xlane.xlu0 %865  ;;  %v971_v17 = vadd.f32 %v3676_v19, %v938_v14  ;;  %v3282_v20 = vpop.eup %3281 }
  0xd2   : > { %3297 = vrcp.f32 %v1095_v12  ;;  %1171 = vperm.xlu1 %3235, %v3274_v0   ;;  %1296 = vperm.xlu0 %3236, %v3280_v11   ;;  %v947_v25 = vadd.f32 %v3676_v19, %v866_v15  ;;  %v1071_v29 = vadd.f32 1.0, %v3282_v20 }
  0xd3   : > { %v3284_v22 = vpop.eup %3283  ;;  %3299 = vpow2.f32 %v3047_v10  ;;  %v3048_v24 = vmul.f32 -1.442695, %v971_v17 }
  0xd4   : > { %3301 = vrcp.f32 %v1090_v13  ;;  %v872_v26 = vpop.xlane.xlu1 %871  ;;  %v3286_v28 = vpop.eup %3285  ;;  %v3024_v35 = vmul.f32 -1.442695, %v947_v25  ;;  %v3726_v13 = vpack.c.bf16 %v1682_v9, %v1681_v6  ;;  %v415_v9 = vld [vmem:[%s3741_s28 + $0x10] sm:$0xff] }
  0xd5   : > { %v869_v27 = vpop.xlane.xlu0 %868  ;;  %3303 = vpow2.f32 %v3048_v24  ;;  %v949_v30 = vadd.f32 %v3676_v19, %v872_v26  ;;  %v3288_v31 = vpop.eup %3287  ;;  %v1096_v32 = vadd.f32 1.0, %v3286_v28 }
  0xd6   : > { %1176 = vperm.xlu1 %3235, %v3284_v22   ;;  %3305 = vpow2.f32 %v3023_v21  ;;  %v948_v36 = vadd.f32 %v3676_v19, %v869_v27  ;;  %v1072_v39 = vadd.f32 1.0, %v3288_v31  ;;  %3214 = vmatprep.subr.bf16.mxu1 %v3726_v13 }
  0xd7   : > { %v3290_v33 = vpop.eup %3289  ;;  %3307 = vrcp.f32 %v1091_v23  ;;  %v3026_v34 = vmul.f32 -1.442695, %v949_v30 }
  0xd8   : > { %3309 = vrcp.f32 %v1096_v32  ;;  %v878_v37 = vpop.xlane.xlu1 %877  ;;  %v3292_v49 = vpop.eup %3291  ;;  %v3025_v18 = vmul.f32 -1.442695, %v948_v36 }
  0xd9   : > { %v875_v38 = vpop.xlane.xlu0 %874  ;;  %3311 = vrcp.f32 %v1071_v29  ;;  %v951_v40 = vadd.f32 %v3676_v19, %v878_v37  ;;  %v3294_v41 = vpop.eup %3293  ;;  %v1097_v42 = vadd.f32 1.0, %v3292_v49 }
  0xda   : > { %3313 = vpow2.f32 %v3026_v34  ;;  %1261 = vperm.xlu1 %3235, %v3290_v33   ;;  %v3296_v43 = vpop.eup %3295  ;;  %v950_v47 = vadd.f32 %v3676_v19, %v875_v38 }
  0xdb   : > { %v3028_v44 = vmul.f32 -1.442695, %v951_v40  ;;  %3315 = vpow2.f32 %v3024_v35  ;;  %v1073_v55 = vadd.f32 1.0, %v3296_v43 }
  0xdc   : > { %v3298_v45 = vpop.eup %3297  ;;  %3317 = vrcp.f32 %v1097_v42  ;;  %v884_v46 = vpop.xlane.xlu1 %883  ;;  %v3027_v60 = vmul.f32 -1.442695, %v950_v47 }
  0xdd   : > { %v881_v48 = vpop.xlane.xlu0 %880  ;;  %v3300_v50 = vpop.eup %3299  ;;  %3319 = vrcp.f32 %v1072_v39  ;;  %v953_v51 = vadd.f32 %v3676_v19, %v884_v46  ;;  %1301 = vperm.xlu0 %3236, %v3298_v45  }
  0xde   : > { %v3302_v52 = vpop.eup %3301  ;;  %v1098_v53 = vadd.f32 1.0, %v3300_v50  ;;  %3321 = vpow2.f32 %v3028_v44  ;;  %1271 = vperm.xlu1 %3235, %v3294_v41   ;;  %v952_v61 = vadd.f32 %v3676_v19, %v881_v48 }
  0xdf   : > { %v3304_v54 = vpop.eup %3303  ;;  %v3030_v56 = vmul.f32 -1.442695, %v953_v51  ;;  %3323 = vpow2.f32 %v3025_v18 }
  0xe0   : > { %v3306_v57 = vpop.eup %3305  ;;  %3325 = vrcp.f32 %v1098_v53  ;;  %v1099_v58 = vadd.f32 1.0, %v3304_v54  ;;  %v890_v59 = vpop.xlane.xlu1 %889  ;;  %v3029_v11 = vmul.f32 -1.442695, %v952_v61  ;;  %v431_v61 = vld [vmem:[%s3741_s28 + $0x90] sm:$0xff] }
  0xe1   : > { %v887_v62 = vpop.xlane.xlu0 %886  ;;  %v3308_v63 = vpop.eup %3307  ;;  %3327 = vpow2.f32 %v3030_v56  ;;  %v955_v0 = vadd.f32 %v3676_v19, %v890_v59  ;;  %v1074_v2 = vadd.f32 1.0, %v3306_v57 }
  0xe2   : > { %v3310_v1 = vpop.eup %3309  ;;  %3329 = vrcp.f32 %v1099_v58  ;;  %1276 = vperm.xlu1 %3235, %v3302_v52   ;;  %v954_v12 = vadd.f32 %v3676_v19, %v887_v62  ;;  %v413_v58 = vld [vmem:[%s3741_s28] sm:$0xff] }
  0xe3   : > { %v3312_v3 = vpop.eup %3311  ;;  %3331 = vrcp.f32 %v1073_v55  ;;  %v3032_v4 = vmul.f32 -1.442695, %v955_v0  ;;  %1306 = vperm.xlu0 %3236, %v3310_v1  }
  0xe4   : > { %v3314_v8 = vpop.eup %3313  ;;  %v896_v10 = vpop.xlane.xlu1 %895  ;;  %3333 = vpow2.f32 %v3027_v60  ;;  %v3031_v24 = vmul.f32 -1.442695, %v954_v12  ;;  %v432_v12 = vld [vmem:[%s3741_s28 + $0x98] sm:$0xff] }
  0xe5   : > { %v3316_v14 = vpop.eup %3315  ;;  %v1077_v15 = vadd.f32 1.0, %v3314_v8  ;;  %3335 = vpow2.f32 %v3032_v4  ;;  %v957_v16 = vadd.f32 %v3676_v19, %v896_v10  ;;  %v893_v17 = vpop.xlane.xlu0 %892 }
  0xe6   : > { %v3318_v20 = vpop.eup %3317  ;;  %3337 = vrcp.f32 %v1074_v2  ;;  %1181 = vperm.xlu1 %3235, %v3312_v3   ;;  %v956_v25 = vadd.f32 %v3676_v19, %v893_v17  ;;  %v1075_v28 = vadd.f32 1.0, %v3316_v14  ;;  %v414_v2 = vld [vmem:[%s3741_s28 + $0x8] sm:$0xff]  ;;  %v1683_v14 = vld [vmem:[%s4646_s5 + $0x10] sm:$0xff] }
  0xe7   : > { %v3320_v21 = vpop.eup %3319  ;;  %3339 = vrcp.f32 %v1077_v15  ;;  %v3034_v22 = vmul.f32 -1.442695, %v957_v16  ;;  %1311 = vperm.xlu0 %3236, %v3318_v20   ;;  %v1684_v15 = vld [vmem:[%s4646_s5 + $0x18] sm:$0xff]  ;;  %v433_v16 = vld [vmem:[%s3741_s28 + $0xa0] sm:$0xff] }
  0xe8   : > { %v3322_v23 = vpop.eup %3321  ;;  %3341 = vpow2.f32 %v3029_v11  ;;  %v3033_v33 = vmul.f32 -1.442695, %v956_v25 }
  0xe9   : > { %v3324_v26 = vpop.eup %3323  ;;  %v1079_v27 = vadd.f32 1.0, %v3322_v23  ;;  %3343 = vpow2.f32 %v3034_v22  ;;  %v434_v23 = vld [vmem:[%s3741_s28 + $0xa8] sm:$0xff] }
  0xea   : > { %v3326_v29 = vpop.eup %3325  ;;  %1281 = vperm.xlu1 %3235, %v3308_v63   ;;  %v1076_v35 = vadd.f32 1.0, %v3324_v26 }
  0xeb   : > { %v3328_v30 = vpop.eup %3327  ;;  %3345 = vrcp.f32 %v1079_v27  ;;  %1316 = vperm.xlu0 %3236, %v3326_v29   ;;  %v435_v27 = vld [vmem:[%s3741_s28 + $0xb0] sm:$0xff] }
  0xec   : > { %v3330_v31 = vpop.eup %3329  ;;  %v1081_v32 = vadd.f32 1.0, %v3328_v30  ;;  %3347 = vpow2.f32 %v3031_v24 }
  0xed   : > { %v3332_v34 = vpop.eup %3331  ;;  %3349 = vrcp.f32 %v1075_v28 }
  0xee   : > { %v3334_v36 = vpop.eup %3333  ;;  %3351 = vrcp.f32 %v1081_v32  ;;  %1186 = vperm.xlu1 %3235, %v3320_v21   ;;  %v3217_v21 = vpack.c.bf16 %v1684_v15, %v1683_v14  ;;  %v3434_v15 = vld [vmem:[%s3525_s24 + $0x8] sm:$0xff] }
  0xef   : > { %v3336_v19 = vpop.eup %3335  ;;  %1321 = vperm.xlu0 %3236, %v3330_v31   ;;  %3353 = vpow2.f32 %v3033_v33  ;;  %v1078_v39 = vadd.f32 1.0, %v3334_v36  ;;  %v416_v31 = vld [vmem:[%s3741_s28 + $0x18] sm:$0xff] }
  0xf0   : > { %v3338_v37 = vpop.eup %3337  ;;  %v1083_v38 = vadd.f32 1.0, %v3336_v19  ;;  %3355 = vrcp.f32 %v1076_v35  ;;  %v436_v35 = vld [vmem:[%s3741_s28 + $0xb8] sm:$0xff] }
  0xf1   : > { %v3340_v49 = vpop.eup %3339 }
  0xf2   : > { %v3342_v40 = vpop.eup %3341  ;;  %3357 = vrcp.f32 %v1083_v38  ;;  %1191 = vperm.xlu1 %3235, %v3332_v34  }
  0xf3   : > { %v3344_v41 = vpop.eup %3343  ;;  %1211 = vperm.xlu0 %3236, %v3340_v49   ;;  %3359 = vrcp.f32 %v1078_v39  ;;  %v1080_v44 = vadd.f32 1.0, %v3342_v40  ;;  %v438_v49 = vld [vmem:[%s3741_s28 + $0xc8] sm:$0xff]  ;;  %v417_v39 = vld [vmem:[%s3741_s28 + $0x20] sm:$0xff]  ;;  %v439_v40 = vld [vmem:[%s3741_s28 + $0xd0] sm:$0xff] }
  0xf4   : > { %v1085_v42 = vadd.f32 1.0, %v3344_v41 }
  0xf5   : > { %v3346_v43 = vpop.eup %3345 }
  0xf6   : > { %v3348_v18 = vpop.eup %3347  ;;  %3361 = vrcp.f32 %v1085_v42  ;;  %1196 = vperm.xlu1 %3235, %v3338_v37  }
  0xf7   : > { %v3350_v45 = vpop.eup %3349  ;;  %1221 = vperm.xlu0 %3236, %v3346_v43   ;;  %3363 = vrcp.f32 %v1080_v44  ;;  %v1082_v47 = vadd.f32 1.0, %v3348_v18 }
  0xf8   : > { %v3352_v46 = vpop.eup %3351 }
  0xf9   : > { %v3354_v48 = vpop.eup %3353  ;;  %3365 = vrcp.f32 %v1082_v47  ;;  %v441_v47 = vld [vmem:[%s3741_s28 + $0xe0] sm:$0xff] }
  0xfa   : > { %1201 = vperm.xlu1 %3235, %v3350_v45   ;;  %v3356_v50 = vpop.eup %3355  ;;  %v1084_v52 = vadd.f32 1.0, %v3354_v48  ;;  %v440_v45 = vld [vmem:[%s3741_s28 + $0xd8] sm:$0xff] }
  0xfb   : > { %1231 = vperm.xlu0 %3236, %v3352_v46   ;;  %v418_v46 = vld [vmem:[%s3741_s28 + $0x28] sm:$0xff] }
  0xfc   : > { %v3358_v51 = vpop.eup %3357  ;;  %3367 = vrcp.f32 %v1084_v52 }
  0xfd   : > { %v3360_v53 = vpop.eup %3359 }
  0xfe   : > { %1206 = vperm.xlu1 %3235, %v3356_v50  }
  0xff   : > { %1241 = vperm.xlu0 %3236, %v3358_v51  }
 0x100   : > { %v3362_v54 = vpop.eup %3361 }
 0x101   : > { %v3364_v55 = vpop.eup %3363 }
 0x102   : > { %1216 = vperm.xlu1 %3235, %v3360_v53   ;;  %v442_v53 = vld [vmem:[%s3741_s28 + $0xe8] sm:$0xff] }
 0x103   : > { %1251 = vperm.xlu0 %3236, %v3362_v54   ;;  %v3366_v56 = vpop.eup %3365  ;;  %v419_v54 = vld [vmem:[%s3741_s28 + $0x30] sm:$0xff] }
 0x106   : > { %1226 = vperm.xlu1 %3235, %v3364_v55   ;;  %v3368_v57 = vpop.eup %3367  ;;  %v443_v55 = vld [vmem:[%s3741_s28 + $0xf0] sm:$0xff] }
 0x10a   : > { %1236 = vperm.xlu1 %3235, %v3366_v56  }
 0x10e   : > { %1246 = vperm.xlu1 %3235, %v3368_v57  }
 0x145   : > { %v1167_v59 = vpop.permute.xlu1 %1166 }
 0x146   : > { %v1324_v60 = vmul.f32 %v1167_v59, %v413_v58 }
 0x148   : > { %3143 = vmatprep.mubr.msk.f32.mxu0 %vm842_vm0, %v1324_v60 }
 0x149   : > { %v1287_v62 = vpop.permute.xlu1 %1286  ;;  %v1257_v63 = vpop.permute.xlu0 %1256 }
 0x14a   : > { %v1342_v0 = vmul.f32 %v1257_v63, %v431_v61  ;;  %v444_v61 = vld [vmem:[%s3741_s28 + $0xf8] sm:$0xff] }
 0x14c   : > { %3170 = vmatprep.mubr.msk.f32.mxu1 %vm842_vm0, %v1342_v0 }
 0x14d   : > { %v1267_v1 = vpop.permute.xlu1 %1266  ;;  %v1292_v3 = vpop.permute.xlu0 %1291 }
 0x14e   : > { %v1344_v22 = vmul.f32 %v1267_v1, %v433_v16  ;;  %v1349_v42 = vmul.f32 %v1292_v3, %v438_v49  ;;  %v421_v3 = vld [vmem:[%s3741_s28 + $0x40] sm:$0xff] }
 0x151   : > { %v1172_v4 = vpop.permute.xlu1 %1171  ;;  %v1297_v11 = vpop.permute.xlu0 %1296 }
 0x152   : > { %v1325_v6 = vmul.f32 %v1172_v4, %v414_v2  ;;  %v1350_v18 = vmul.f32 %v1297_v11, %v439_v40  ;;  %v422_v4 = vld [vmem:[%s3741_s28 + $0x48] sm:$0xff]  ;;  %v423_v11 = vld [vmem:[%s3741_s28 + $0x50] sm:$0xff] }
 0x154   : > { %3144 = vmatmul.mubr.msk.f32.vlgmr.msra.gmra.mrb[0].mxu0 %vm842_vm0, %v1325_v6 }
 0x155   : > { %v1177_v8 = vpop.permute.xlu1 %1176 }
 0x156   : > { %v1326_v10 = vmul.f32 %v1177_v8, %v415_v9  ;;  %v3433_v9 = vld [vmem:[%s3525_s24] sm:$0xff] }
 0x158   : > { %3146 = vmatprep.mubr.msk.f32.mxu0 %vm842_vm0, %v1326_v10 }
 0x159   : > { %v1262_v17 = vpop.permute.xlu1 %1261 }
 0x15a   : > { %v1343_v20 = vmul.f32 %v1262_v17, %v432_v12  ;;  %v424_v12 = vld [vmem:[%s3741_s28 + $0x58] sm:$0xff]  ;;  %v3435_v17 = vld [vmem:[%s3525_s24 + $0x10] sm:$0xff] }
 0x15c   : > { %3171 = vmatmul.mubr.msk.f32.vlgmr.msra.gmra.mrb[0].mxu1 %vm842_vm0, %v1343_v20  ;;  %v1302_v24 = vpop.permute.xlu0 %1301 }
 0x15d   : > { %v1272_v25 = vpop.permute.xlu1 %1271  ;;  %3173 = vmatprep.mubr.msk.f32.mxu1 %vm842_vm0, %v1344_v22  ;;  %3216 = vmatpush3.bf16.msra.mxu1 %v3726_v13  ;;  %v437_v13 = vld [vmem:[%s3741_s28 + $0xc0] sm:$0xff]  ;;  %v1351_v50 = vmul.f32 %v1302_v24, %v440_v45  ;;  %v3436_v24 = vld [vmem:[%s3525_s24 + $0x18] sm:$0xff] }
 0x15e   : > { %v1345_v26 = vmul.f32 %v1272_v25, %v434_v23  ;;  %3218 = vmatprep.subr.bf16.mxu1 %v3217_v21  ;;  %v1348_v38 = vmul.f32 %v1287_v62, %v437_v13  ;;  %v420_v62 = vld [vmem:[%s3741_s28 + $0x38] sm:$0xff]  ;;  %v425_v22 = vld [vmem:[%s3741_s28 + $0x60] sm:$0xff]  ;;  %v426_v23 = vld [vmem:[%s3741_s28 + $0x68] sm:$0xff] }
 0x15f   : > { %v430_v13 = vld [vmem:[%s3741_s28 + $0x88] sm:$0xff] }
 0x160   : > { %3174 = vmatmul.mubr.msk.f32.gmra.mrb[2].mxu1 %vm842_vm0, %v1345_v26 }
 0x161   : > { %v1277_v28 = vpop.permute.xlu1 %1276  ;;  %3220 = vmatpush3.bf16.msra.mxu1 %v3217_v21 }
 0x162   : > { %v1346_v29 = vmul.f32 %v1277_v28, %v435_v27  ;;  %v1307_v30 = vpop.permute.xlu0 %1306 }
 0x163   : > { %v1352_v52 = vmul.f32 %v1307_v30, %v441_v47  ;;  %v428_v30 = vld [vmem:[%s3741_s28 + $0x78] sm:$0xff] }
 0x164   : > { %3176 = vmatprep.mubr.msk.f32.mxu1 %vm842_vm0, %v1346_v29  ;;  %v427_v29 = vld [vmem:[%s3741_s28 + $0x70] sm:$0xff] }
 0x165   : > { %v1182_v32 = vpop.permute.xlu1 %1181 }
 0x166   : > { %v1327_v33 = vmul.f32 %v1182_v32, %v416_v31  ;;  %v1312_v34 = vpop.permute.xlu0 %1311 }
 0x167   : > { %v1353_v58 = vmul.f32 %v1312_v34, %v442_v53  ;;  %v429_v34 = vld [vmem:[%s3741_s28 + $0x80] sm:$0xff] }
 0x168   : > { %3147 = vmatmul.mubr.msk.f32.gmra.mrb[2].mxu0 %vm842_vm0, %v1327_v33 }
 0x169   : > { %v1282_v36 = vpop.permute.xlu1 %1281 }
 0x16a   : > { %v1347_v19 = vmul.f32 %v1282_v36, %v436_v35  ;;  %v1317_v37 = vpop.permute.xlu0 %1316 }
 0x16b   : > { %v1354_v60 = vmul.f32 %v1317_v37, %v443_v55 }
 0x16c   : > { %3177 = vmatmul.mubr.msk.f32.gmra.mrb[4].mxu1 %vm842_vm0, %v1347_v19 }
 0x16d   : > { %v1187_v41 = vpop.permute.xlu1 %1186  ;;  %3179 = vmatprep.mubr.msk.f32.mxu1 %vm842_vm0, %v1348_v38 }
 0x16e   : > { %v1328_v43 = vmul.f32 %v1187_v41, %v417_v39  ;;  %v1322_v44 = vpop.permute.xlu0 %1321 }
 0x16f   : > { %v1355_v0 = vmul.f32 %v1322_v44, %v444_v61 }
 0x170   : > { %3149 = vmatprep.mubr.msk.f32.mxu0 %vm842_vm0, %v1328_v43  ;;  %3180 = vmatmul.mubr.msk.f32.gmra.mrb[6].mxu1 %vm842_vm0, %v1349_v42 }
 0x171   : > { %v1192_v48 = vpop.permute.xlu1 %1191  ;;  %3182 = vmatprep.mubr.msk.f32.mxu1 %vm842_vm0, %v1350_v18 }
 0x172   : > { %v1329_v51 = vmul.f32 %v1192_v48, %v418_v46  ;;  %v1212_v56 = vpop.permute.xlu0 %1211 }
 0x173   : > { %v1333_v10 = vmul.f32 %v1212_v56, %v422_v4 }
 0x174   : > { %3150 = vmatmul.mubr.msk.f32.gmra.mrb[4].mxu0 %vm842_vm0, %v1329_v51  ;;  %3183 = vmatmul.mubr.msk.f32.gmra.mrb[8].mxu1 %vm842_vm0, %v1351_v50 }
 0x175   : > { %v1197_v57 = vpop.permute.xlu1 %1196  ;;  %3185 = vmatprep.mubr.msk.f32.mxu1 %vm842_vm0, %v1352_v52 }
 0x176   : > { %v1330_v59 = vmul.f32 %v1197_v57, %v419_v54  ;;  %v1222_v1 = vpop.permute.xlu0 %1221 }
 0x177   : > { %v1335_v21 = vmul.f32 %v1222_v1, %v424_v12 }
 0x178   : > { %3152 = vmatprep.mubr.msk.f32.mxu0 %vm842_vm0, %v1330_v59  ;;  %3186 = vmatmul.mubr.msk.f32.gmra.mrb[10].mxu1 %vm842_vm0, %v1353_v58 }
 0x179   : > { %v1202_v63 = vpop.permute.xlu1 %1201  ;;  %3188 = vmatprep.mubr.msk.f32.mxu1 %vm842_vm0, %v1354_v60 }
 0x17a   : > { %v1331_v2 = vmul.f32 %v1202_v63, %v420_v62  ;;  %v1232_v14 = vpop.permute.xlu0 %1231 }
 0x17b   : > { %v1337_v28 = vmul.f32 %v1232_v14, %v426_v23 }
 0x17c   : > { %3153 = vmatmul.mubr.msk.f32.gmra.mrb[6].mxu0 %vm842_vm0, %v1331_v2  ;;  %3189 = vmatmul.mubr.msk.f32.gmra.mrb[12].mxu1 %vm842_vm0, %v1355_v0 }
 0x17d   : > { %v1207_v6 = vpop.permute.xlu1 %1206  ;;  %3199 = vmatprep.mubr.msk.f32.mxu1 %vm842_vm0, %v3433_v9 }
 0x17e   : > { %v1332_v8 = vmul.f32 %v1207_v6, %v421_v3  ;;  %v1242_v26 = vpop.permute.xlu0 %1241 }
 0x17f   : > { %v1339_v33 = vmul.f32 %v1242_v26, %v428_v30 }
 0x180   : > { %3155 = vmatprep.mubr.msk.f32.mxu0 %vm842_vm0, %v1332_v8  ;;  %3200 = vmatmul.mubr.msk.f32.vlgmr.msra.gmra.mrb[14].mxu1 %vm842_vm0, %v3434_v15 }
 0x181   : > { %v1217_v16 = vpop.permute.xlu1 %1216  ;;  %3156 = vmatmul.mubr.msk.f32.gmra.mrb[8].mxu0 %vm842_vm0, %v1333_v10  ;;  %3202 = vmatprep.mubr.msk.f32.mxu1 %vm842_vm0, %v3435_v17 }
 0x182   : > { %v1334_v20 = vmul.f32 %v1217_v16, %v423_v11  ;;  %v1252_v35 = vpop.permute.xlu0 %1251 }
 0x183   : > { %v1341_v37 = vmul.f32 %v1252_v35, %v430_v13 }
 0x184   : > { %3158 = vmatprep.mubr.msk.f32.mxu0 %vm842_vm0, %v1334_v20  ;;  %3203 = vmatmul.mubr.msk.f32.gmra.mrb[16].mxu1 %vm842_vm0, %v3436_v24 }
 0x185   : > { %v1227_v25 = vpop.permute.xlu1 %1226  ;;  %3159 = vmatmul.mubr.msk.f32.gmra.mrb[10].mxu0 %vm842_vm0, %v1335_v21 }
 0x186   : > { %v1336_v27 = vmul.f32 %v1227_v25, %v425_v22 }
 0x188   : > { %3161 = vmatprep.mubr.msk.f32.mxu0 %vm842_vm0, %v1336_v27 }
 0x189   : > { %v1237_v31 = vpop.permute.xlu1 %1236  ;;  %3162 = vmatmul.mubr.msk.f32.gmra.mrb[12].mxu0 %vm842_vm0, %v1337_v28 }
 0x18a   : > { %v1338_v32 = vmul.f32 %v1237_v31, %v427_v29 }
 0x18c   : > { %3164 = vmatprep.mubr.msk.f32.mxu0 %vm842_vm0, %v1338_v32 }
 0x18d   : > { %v1247_v36 = vpop.permute.xlu1 %1246  ;;  %3165 = vmatmul.mubr.msk.f32.gmra.mrb[14].mxu0 %vm842_vm0, %v1339_v33 }
 0x18e   : > { %v1340_v19 = vmul.f32 %v1247_v36, %v429_v34  ;;  %v3896_v36 = vld [vmem:[%s4647_s6] ss:$0 sm:$0xff] }
 0x190   : > { %3167 = vmatprep.mubr.msk.f32.mxu0 %vm842_vm0, %v1340_v19 }
 0x191   : > { %3168 = vmatmul.mubr.msk.f32.gmra.mrb[16].mxu0 %vm842_vm0, %v1341_v37 }
 0x227   : > { %v3822_v38 = vpop.f32.mrb[0].mxu0 }
 0x228   : > { %v3824_v49 = vpop.f32.mrb[1].mxu0 }
 0x22f   : > { %v3826_v39 = vpop.f32.mrb[0].mxu1 }
 0x230   : > { %v3828_v40 = vpop.f32.mrb[1].mxu1 }
 0x233   : > { %v3830_v41 = vpop.f32.mrb[2].mxu1 }
 0x234   : > { %v3832_v42 = vpop.f32.mrb[3].mxu1 }
 0x23b   : > { %v3834_v43 = vpop.f32.mrb[2].mxu0 }
 0x23c   : > { %v3836_v44 = vpop.f32.mrb[3].mxu0 }
 0x23f   : > { %v3838_v18 = vpop.f32.mrb[4].mxu1 }
 0x240   : > { %v3840_v45 = vpop.f32.mrb[5].mxu1 }
 0x243   : > { %v3842_v46 = vpop.f32.mrb[6].mxu1 }
 0x244   : > { %v3844_v47 = vpop.f32.mrb[7].mxu1 }
 0x247   : > { %v3846_v48 = vpop.f32.mrb[4].mxu0  ;;  %v3848_v50 = vpop.f32.mrb[8].mxu1 }
 0x248   : > { %v3850_v51 = vpop.f32.mrb[5].mxu0  ;;  %v3852_v52 = vpop.f32.mrb[9].mxu1 }
 0x24b   : > { %v3854_v53 = vpop.f32.mrb[10].mxu1 }
 0x24c   : > { %v3856_v54 = vpop.f32.mrb[11].mxu1 }
 0x24f   : > { %v3858_v55 = vpop.f32.mrb[6].mxu0  ;;  %v3860_v56 = vpop.f32.mrb[12].mxu1 }
 0x250   : > { %v3862_v57 = vpop.f32.mrb[7].mxu0  ;;  %v3864_v58 = vpop.f32.mrb[13].mxu1 }
 0x253   : > { %v3201_v59 = vpop.f32.mrb[14].mxu1 }
 0x254   : > { %v1838_v60 = vrot.slane %v3201_v59, %v3520_v5  ;;  %v3157_v61 = vpop.f32.mrb[8].mxu0  ;;  %v1759_v62 = vpop.f32.mrb[15].mxu1  ;;  %v1831_v63 = vcombine.high %v3201_v59, %v3201_v59 }
 0x255   : > { %v1782_v0 = vcombine.high %v1759_v62, %v1759_v62  ;;  %v1789_v1 = vrot.slane %v1759_v62, %v3520_v5  ;;  %v1562_v2 = vpop.f32.mrb[9].mxu0 }
 0x256   : > { %v1846_v3 = vcombine.high %v1838_v60, %v1838_v60  ;;  %v1854_v4 = vrot.slane %v1838_v60, %v3520_v5  ;;  %v1845_v15 = vrot.slane %v1831_v63, %v3520_v5 }
 0x257   : > { %v1796_v6 = vrot.slane %v1782_v0, %v3520_v5  ;;  %v3204_v9 = vpop.f32.mrb[16].mxu1  ;;  %v1797_v10 = vcombine.high %v1789_v1, %v1789_v1  ;;  %v3875_v20 = vrot.slane %v1789_v1, %v3520_v5 }
 0x258   : > { %v1868_v8 = vrot.slane %v1846_v3, %v3520_v5  ;;  %v2013_v11 = vrot.slane %v1854_v4, %v3528_v7  ;;  %v3160_v12 = vpop.f32.mrb[10].mxu0  ;;  %v1769_v14 = vpop.f32.mrb[17].mxu1  ;;  %v1847_v28 = vcombine.high %v1845_v15, %v1845_v15  ;;  %v1929_v29 = vcombine.high %v3204_v9, %v3204_v9 }
 0x259   : > { %v1572_v16 = vpop.f32.mrb[11].mxu0  ;;  %v1798_v22 = vcombine.high %v1796_v6, %v1796_v6  ;;  %v3878_v24 = vrot.slane %v1796_v6, %v3520_v5  ;;  %v3881_v25 = vrot.slane %v1797_v10, %v3520_v5  ;;  %v1936_v30 = vrot.slane %v3204_v9, %v3520_v5 }
 0x25a   : > { %v2017_v17 = vrot.slane %v1868_v8, %v3528_v7  ;;  %v2146_v21 = vadd.f32 %v2013_v11, %v1562_v2  ;;  %v1878_v26 = vcombine.high %v1868_v8, %v1868_v8  ;;  %v1981_v32 = vrot.slane %v3875_v20, %v3528_v7 }
 0x25b   : > { %v3888_v34 = vrot.slane %v1798_v22, %v3520_v5  ;;  %v1827_v35 = vcombine.high %v3875_v20, %v3875_v20  ;;  %v1887_v13 = vrot.slane %v1769_v14, %v3520_v5  ;;  %v1828_v19 = vcombine.high %v3878_v24, %v3878_v24 }
 0x25c   : > { %v2147_v23 = vadd.f32 %v3157_v61, %v2017_v17  ;;  %v3163_v27 = vpop.f32.mrb[12].mxu0  ;;  %v2025_v33 = vrot.slane %v1878_v26, %v3528_v7  ;;  %v1829_v37 = vcombine.high %v3881_v25, %v3881_v25  ;;  %v1876_v60 = vcombine.high %v1854_v4, %v1854_v4 }
 0x25d   : > { %v1582_v31 = vpop.f32.mrb[13].mxu0  ;;  %v3903_v62 = vrot.slane %v1929_v29, %v3520_v5  ;;  %v1944_v63 = vcombine.high %v1936_v30, %v1936_v30  ;;  %v1875_v0 = vrot.slane %v1847_v28, %v3520_v5  ;;  %v1861_v1 = vrot.slane %v1845_v15, %v3520_v5 }
 0x25e   : > { %v2149_v59 = vadd.f32 %v3160_v12, %v2025_v33  ;;  %v3908_v3 = vrot.slane %v1936_v30, %v3520_v5  ;;  %v2021_v6 = vrot.slane %v1876_v60, %v3528_v7  ;;  %v3912_v9 = vadd.f32 %v3896_v36, %v2146_v21 }
 0x25f   : > { %v2138_v4 = vadd.f32 %v1981_v32, %v3824_v49  ;;  %v1880_v8 = vcombine.high %v1769_v14, %v1769_v14  ;;  %v1895_v10 = vcombine.high %v1887_v13, %v1887_v13  ;;  %v2033_v11 = vrot.slane %v1875_v0, %v3528_v7 }
 0x260   : > { %v3166_v61 = vpop.f32.mrb[14].mxu0  ;;  %v2029_v12 = vrot.slane %v1861_v1, %v3528_v7  ;;  %v2148_v17 = vadd.f32 %v2021_v6, %v1572_v16  ;;  %v2233_v15 = vsel %vm842_vm0, %v3912_v9, 0.0  ;;  %v1879_v22 = vcombine.high %v1875_v0, %v1875_v0 }
 0x261   : > { %v1592_v2 = vpop.f32.mrb[15].mxu0  ;;  %v3920_v20 = vadd.f32 %v3896_v36, %v2138_v4  ;;  %v3923_v21 = vrot.slane %v1887_v13, %v3520_v5  ;;  %v2151_v28 = vadd.f32 %v3163_v27, %v2033_v11  ;;  %2234 = vadd.xlane.f32.xlu0 %v2233_v15  ;;  %v1877_v14 = vcombine.high %v1861_v1, %v1861_v1 }
 0x262   : > { %v2150_v49 = vadd.f32 %v2029_v12, %v1582_v31  ;;  %v2041_v16 = vrot.slane %v1879_v22, %v3528_v7  ;;  %v3929_v32 = vadd.f32 %v3896_v36, %v2148_v17  ;;  %v3932_v33 = vadd.f32 %v3896_v36, %v2147_v23 }
 0x263   : > { %v2209_v30 = vsel %vm842_vm0, %v3920_v20, 0.0  ;;  %v1945_v13 = vcombine.high %v3903_v62, %v3903_v62  ;;  %v2037_v27 = vrot.slane %v1877_v14, %v3528_v7  ;;  %v3938_v31 = vrot.slane %v1895_v10, %v3520_v5 }
 0x264   : > { %v3169_v26 = vpop.f32.mrb[16].mxu0  ;;  %2210 = vadd.xlane.f32.xlu1 %v2209_v30  ;;  %v2045_v60 = vrot.slane %v3923_v21, %v3528_v7  ;;  %v1894_v0 = vrot.slane %v1880_v8, %v3520_v5  ;;  %v3943_v1 = vadd.f32 %v3166_v61, %v2041_v16  ;;  %v2239_v23 = vsel %vm842_vm0, %v3929_v32, 0.0 }
 0x265   : > { %v1602_v29 = vpop.f32.mrb[17].mxu0  ;;  %v3948_v6 = vadd.f32 %v3896_v36, %v2150_v49  ;;  %v2152_v4 = vadd.f32 %v2037_v27, %v1592_v2  ;;  %2240 = vadd.xlane.f32.xlu0 %v2239_v23  ;;  %v2049_v11 = vrot.slane %v3938_v31, %v3528_v7  ;;  %v3955_v12 = vadd.f32 %v3896_v36, %v2149_v59 }
 0x266   : > { %v3952_v10 = vadd.f32 %v2045_v60, %v1602_v29  ;;  %v1966_v8 = vrot.slane %v1944_v63, %v3520_v5  ;;  %v2077_v61 = vrot.slane %v3908_v3, %v3528_v7  ;;  %v2236_v17 = vsel %vm842_vm0, %v3932_v33, 0.0 }
 0x267   : > { %v1985_v2 = vrot.slane %v3881_v25, %v3528_v7  ;;  %v3964_v15 = vadd.f32 %v3169_v26, %v2049_v11  ;;  %v1989_v22 = vrot.slane %v1827_v35, %v3528_v7  ;;  %v1993_v49 = vrot.slane %v1829_v37, %v3528_v7 }
 0x268   : > { %2237 = vadd.xlane.f32.xlu1 %v2236_v17  ;;  %v1997_v59 = vrot.slane %v3878_v24, %v3528_v7  ;;  %v1896_v63 = vcombine.high %v1894_v0, %v1894_v0  ;;  %v2245_v14 = vsel %vm842_vm0, %v3948_v6, 0.0  ;;  %v2001_v30 = vrot.slane %v3888_v34, %v3528_v7 }
 0x269   : > { %v2139_v29 = vadd.f32 %v3822_v38, %v1985_v2  ;;  %2246 = vadd.xlane.f32.xlu0 %v2245_v14  ;;  %v2242_v25 = vsel %vm842_vm0, %v3955_v12, 0.0  ;;  %v2140_v35 = vadd.f32 %v1989_v22, %v3836_v44  ;;  %v2141_v37 = vadd.f32 %v3834_v43, %v1993_v49 }
 0x26a   : > { %v2142_v26 = vadd.f32 %v1997_v59, %v3850_v51  ;;  %v3984_v27 = vadd.f32 %v3896_v36, %v2151_v28  ;;  %v2143_v38 = vadd.f32 %v3846_v48, %v2001_v30  ;;  %v2162_v60 = vadd.f32 %v2077_v61, %v3844_v47 }
 0x26b   : > { %v3981_v16 = vadd.f32 %v3896_v36, %v2139_v29  ;;  %v1959_v23 = vrot.slane %v3903_v62, %v3520_v5  ;;  %v3991_v11 = vrot.slane %v1945_v13, %v3520_v5  ;;  %v1974_v43 = vcombine.high %v3908_v3, %v3908_v3 }
 0x26c   : > { %2243 = vadd.xlane.f32.xlu1 %v2242_v25  ;;  %v1976_v44 = vcombine.high %v1966_v8, %v1966_v8  ;;  %v3998_v28 = vadd.f32 %v3896_v36, %v2140_v35  ;;  %v2081_v48 = vrot.slane %v1966_v8, %v3528_v7  ;;  %v1910_v47 = vrot.slane %v1894_v0, %v3520_v5 }
 0x26d   : > { %v2212_v51 = vsel %vm842_vm0, %v3981_v16, 0.0  ;;  %v1924_v62 = vrot.slane %v1896_v63, %v3520_v5  ;;  %v1925_v13 = vcombine.high %v3923_v21, %v3923_v21  ;;  %v2005_v3 = vrot.slane %v1828_v19, %v3528_v7 }
 0x26e   : > { %2213 = vadd.xlane.f32.xlu0 %v2212_v51  ;;  %v2248_v61 = vsel %vm842_vm0, %v3984_v27, 0.0  ;;  %v4012_v17 = vadd.f32 %v3896_v36, %v2141_v37  ;;  %v2163_v8 = vadd.f32 %v3842_v46, %v2081_v48  ;;  %v1830_v5 = vcombine.high %v3888_v34, %v3888_v34 }
 0x26f   : > { %v1927_v21 = vcombine.high %v3938_v31, %v3938_v31  ;;  %v4020_v0 = vadd.f32 %v3896_v36, %v2142_v26  ;;  %v2144_v24 = vadd.f32 %v2005_v3, %v3862_v57  ;;  %v2085_v19 = vrot.slane %v1974_v43, %v3528_v7 }
 0x270   : > { %2249 = vadd.xlane.f32.xlu1 %v2248_v61  ;;  %v2215_v2 = vsel %vm842_vm0, %v3998_v28, 0.0  ;;  %v2009_v22 = vrot.slane %v1830_v5, %v3528_v7  ;;  %v2089_v46 = vrot.slane %v1976_v44, %v3528_v7  ;;  %v2093_v34 = vrot.slane %v1959_v23, %v3528_v7 }
 0x271   : > { %v4030_v31 = vadd.f32 %v3896_v36, %v2143_v38  ;;  %v2164_v49 = vadd.f32 %v2085_v19, %v3852_v52  ;;  %v2218_v57 = vsel %vm842_vm0, %v4012_v17, 0.0  ;;  %v1975_v29 = vcombine.high %v1959_v23, %v1959_v23 }
 0x272   : > { %2216 = vadd.xlane.f32.xlu0 %v2215_v2  ;;  %v2145_v59 = vadd.f32 %v3858_v55, %v2009_v22  ;;  %v2165_v63 = vadd.f32 %v3848_v50, %v2089_v46  ;;  %v2166_v14 = vadd.f32 %v2093_v34, %v3856_v54  ;;  %v4039_v30 = vadd.f32 %v3896_v36, %v2152_v4 }
 0x273   : > { %v2097_v25 = vrot.slane %v3991_v11, %v3528_v7  ;;  %v2053_v35 = vrot.slane %v1925_v13, %v3528_v7  ;;  %v1926_v52 = vcombine.high %v1910_v47, %v1910_v47  ;;  %v1928_v37 = vcombine.high %v1924_v62, %v1924_v62 }
 0x274   : > { %2219 = vadd.xlane.f32.xlu1 %v2218_v57  ;;  %v2221_v26 = vsel %vm842_vm0, %v4020_v0, 0.0  ;;  %v2057_v55 = vrot.slane %v1927_v21, %v3528_v7  ;;  %v4049_v50 = vadd.f32 %v3896_v36, %v3943_v1  ;;  %v2061_v38 = vrot.slane %v1910_v47, %v3528_v7 }
 0x275   : > { %v2167_v54 = vadd.f32 %v3854_v53, %v2097_v25  ;;  %v2156_v4 = vadd.f32 %v2053_v35, %v3828_v40  ;;  %v2224_v23 = vsel %vm842_vm0, %v4030_v31, 0.0  ;;  %v2251_v44 = vsel %vm842_vm0, %v4039_v30, 0.0 }
 0x276   : > { %2222 = vadd.xlane.f32.xlu0 %v2221_v26  ;;  %v2157_v43 = vadd.f32 %v3826_v39, %v2057_v55  ;;  %v2158_v51 = vadd.f32 %v2061_v38, %v3832_v42  ;;  %v2065_v1 = vrot.slane %v1924_v62, %v3528_v7  ;;  %v4062_v48 = vadd.f32 %v3896_v36, %v2162_v60 }
 0x277   : > { %v2069_v40 = vrot.slane %v1926_v52, %v3528_v7  ;;  %v2073_v53 = vrot.slane %v1928_v37, %v3528_v7  ;;  %v2101_v47 = vrot.slane %v1975_v29, %v3528_v7  ;;  %v2254_v39 = vsel %vm842_vm0, %v4049_v50, 0.0 }
 0x278   : > { %2225 = vadd.xlane.f32.xlu1 %v2224_v23  ;;  %v2159_v13 = vadd.f32 %v3830_v41, %v2065_v1  ;;  %v4071_v3 = vadd.f32 %v3896_v36, %v2163_v8  ;;  %v1977_v61 = vcombine.high %v3991_v11, %v3991_v11  ;;  %v2281_v5 = vsel %vm842_vm0, %v4062_v48, 0.0 }
 0x279   : > { %v2160_v42 = vadd.f32 %v2069_v40, %v3840_v45  ;;  %v2161_v60 = vadd.f32 %v3838_v18, %v2073_v53  ;;  %v2168_v62 = vadd.f32 %v2101_v47, %v3864_v58  ;;  %v4081_v21 = vadd.f32 %v3896_v36, %v2144_v24 }
 0x27a   : > { %2252 = vadd.xlane.f32.xlu0 %v2251_v44  ;;  %v2105_v41 = vrot.slane %v1977_v61, %v3528_v7  ;;  %v2284_v45 = vsel %vm842_vm0, %v4071_v3, 0.0  ;;  %v4087_v18 = vadd.f32 %v3896_v36, %v2145_v59  ;;  %v4094_v8 = vadd.f32 %v3896_v36, %v3952_v10 }
 0x27b   : > { %v2227_v11 = vsel %vm842_vm0, %v4081_v21, 0.0  ;;  %v4100_v24 = vadd.f32 %v3896_v36, %v3964_v15  ;;  %v4110_v2 = vadd.f32 %v3896_v36, %v2165_v63  ;;  %v4115_v15 = vadd.f32 %v3896_v36, %v2166_v14 }
 0x27c   : > { %2255 = vadd.xlane.f32.xlu1 %v2254_v39  ;;  %v2169_v58 = vadd.f32 %v3860_v56, %v2105_v41  ;;  %v2230_v7 = vsel %vm842_vm0, %v4087_v18, 0.0  ;;  %v2257_v19 = vsel %vm842_vm0, %v4094_v8, 0.0  ;;  %v4105_v56 = vadd.f32 %v3896_v36, %v2164_v49 }
 0x27d   : > { %v2260_v10 = vsel %vm842_vm0, %v4100_v24, 0.0  ;;  %v2290_v46 = vsel %vm842_vm0, %v4110_v2, 0.0  ;;  %v4120_v34 = vadd.f32 %v3896_v36, %v2167_v54  ;;  %v2293_v49 = vsel %vm842_vm0, %v4115_v15, 0.0 }
 0x27e   : > { %2282 = vadd.xlane.f32.xlu0 %v2281_v5  ;;  %v2287_v22 = vsel %vm842_vm0, %v4105_v56, 0.0  ;;  %v4125_v57 = vadd.f32 %v3896_v36, %v2156_v4  ;;  %v4130_v63 = vadd.f32 %v3896_v36, %v2157_v43  ;;  %v4135_v29 = vadd.f32 %v3896_v36, %v2158_v51 }
 0x27f   : > { %v2296_v59 = vsel %vm842_vm0, %v4120_v34, 0.0  ;;  %v4140_v35 = vadd.f32 %v3896_v36, %v2159_v13  ;;  %v4145_v37 = vadd.f32 %v3896_v36, %v2160_v42  ;;  %v4150_v55 = vadd.f32 %v3896_v36, %v2161_v60 }
 0x280   : > { %2285 = vadd.xlane.f32.xlu1 %v2284_v45  ;;  %v2263_v14 = vsel %vm842_vm0, %v4125_v57, 0.0  ;;  %v2266_v25 = vsel %vm842_vm0, %v4130_v63, 0.0  ;;  %v2269_v52 = vsel %vm842_vm0, %v4135_v29, 0.0  ;;  %v4155_v4 = vadd.f32 %v3896_v36, %v2168_v62 }
 0x281   : > { %v2272_v26 = vsel %vm842_vm0, %v4140_v35, 0.0  ;;  %v2275_v54 = vsel %vm842_vm0, %v4145_v37, 0.0  ;;  %v2278_v38 = vsel %vm842_vm0, %v4150_v55, 0.0  ;;  %v4160_v23 = vadd.f32 %v3896_v36, %v2169_v58 }
 0x282   : > { %2228 = vadd.xlane.f32.xlu0 %v2227_v11  ;;  %v2299_v43 = vsel %vm842_vm0, %v4155_v4, 0.0 }
 0x283   : > { %v2302_v44 = vsel %vm842_vm0, %v4160_v23, 0.0 }
 0x284   : > { %2231 = vadd.xlane.f32.xlu1 %v2230_v7 }
 0x286   : > { %2258 = vadd.xlane.f32.xlu0 %v2257_v19 }
 0x288   : > { %2261 = vadd.xlane.f32.xlu1 %v2260_v10 }
 0x28a   : > { %2288 = vadd.xlane.f32.xlu0 %v2287_v22 }
 0x28c   : > { %2291 = vadd.xlane.f32.xlu1 %v2290_v46 }
 0x28e   : > { %2294 = vadd.xlane.f32.xlu0 %v2293_v49 }
 0x290   : > { %2297 = vadd.xlane.f32.xlu1 %v2296_v59 }
 0x292   : > { %2264 = vadd.xlane.f32.xlu0 %v2263_v14 }
 0x294   : > { %2267 = vadd.xlane.f32.xlu1 %v2266_v25 }
 0x296   : > { %2270 = vadd.xlane.f32.xlu0 %v2269_v52 }
 0x298   : > { %2273 = vadd.xlane.f32.xlu1 %v2272_v26 }
 0x29a   : > { %2276 = vadd.xlane.f32.xlu0 %v2275_v54 }
 0x29c   : > { %2279 = vadd.xlane.f32.xlu1 %v2278_v38 }
 0x29e   : > { %2300 = vadd.xlane.f32.xlu0 %v2299_v43 }
 0x2a0   : > { %2303 = vadd.xlane.f32.xlu1 %v2302_v44 }
 0x2ee   : > { %v2235_v51 = vpop.xlane.xlu0 %2234 }
 0x2ef   : > { %v2314_v1 = vmul.f32 0.03125, %v2235_v51 }
 0x2f1   : > { %v2211_v40 = vpop.xlane.xlu1 %2210  ;;  %v4167_v53 = vsub.f32 %v3912_v9, %v2314_v1 }
 0x2f2   : > { %v2306_v47 = vmul.f32 0.03125, %v2211_v40  ;;  %v2241_v39 = vpop.xlane.xlu0 %2240 }
 0x2f3   : > { %v2316_v13 = vmul.f32 0.03125, %v2241_v39  ;;  %v2378_v42 = vmul.f32 %v4167_v53, %v4167_v53 }
 0x2f4   : > { %v4170_v36 = vsub.f32 %v3920_v20, %v2306_v47 }
 0x2f5   : > { %v2238_v60 = vpop.xlane.xlu1 %2237  ;;  %v4175_v62 = vsub.f32 %v3929_v32, %v2316_v13  ;;  %v2426_v5 = vsel %vm842_vm0, %v2378_v42, 0.0 }
 0x2f6   : > { %v2315_v61 = vmul.f32 0.03125, %v2238_v60  ;;  %v2370_v9 = vmul.f32 %v4170_v36, %v4170_v36  ;;  %v2247_v41 = vpop.xlane.xlu0 %2246  ;;  %2427 = vadd.xlane.f32.xlu0 %v2426_v5 }
 0x2f7   : > { %v2318_v20 = vmul.f32 0.03125, %v2247_v41  ;;  %v2380_v10 = vmul.f32 %v4175_v62, %v4175_v62 }
 0x2f8   : > { %v4181_v45 = vsub.f32 %v3932_v33, %v2315_v61  ;;  %v2402_v11 = vsel %vm842_vm0, %v2370_v9, 0.0 }
 0x2f9   : > { %v2244_v58 = vpop.xlane.xlu1 %2243  ;;  %v4185_v7 = vsub.f32 %v3948_v6, %v2318_v20  ;;  %v2432_v52 = vsel %vm842_vm0, %v2380_v10, 0.0 }
 0x2fa   : > { %v2317_v32 = vmul.f32 0.03125, %v2244_v58  ;;  %v2379_v19 = vmul.f32 %v4181_v45, %v4181_v45  ;;  %2403 = vadd.xlane.f32.xlu0 %v2402_v11 }
 0x2fb   : > { %v2214_v22 = vpop.xlane.xlu0 %2213  ;;  %v2382_v59 = vmul.f32 %v4185_v7, %v4185_v7 }
 0x2fc   : > { %v2307_v46 = vmul.f32 0.03125, %v2214_v22  ;;  %v2429_v33 = vsel %vm842_vm0, %v2379_v19, 0.0  ;;  %v4195_v6 = vsub.f32 %v3955_v12, %v2317_v32 }
 0x2fd   : > { %v2250_v49 = vpop.xlane.xlu1 %2249  ;;  %2430 = vadd.xlane.f32.xlu1 %v2429_v33  ;;  %v2438_v51 = vsel %vm842_vm0, %v2382_v59, 0.0 }
 0x2fe   : > { %v4198_v14 = vsub.f32 %v3981_v16, %v2307_v46  ;;  %v2319_v25 = vmul.f32 0.03125, %v2250_v49  ;;  %2433 = vadd.xlane.f32.xlu0 %v2432_v52  ;;  %v2381_v40 = vmul.f32 %v4195_v6, %v4195_v6 }
 0x2ff   : > { %v2217_v26 = vpop.xlane.xlu0 %2216 }
 0x300   : > { %v2308_v54 = vmul.f32 0.03125, %v2217_v26  ;;  %v2371_v38 = vmul.f32 %v4198_v14, %v4198_v14  ;;  %v4204_v43 = vsub.f32 %v3984_v27, %v2319_v25  ;;  %v2435_v5 = vsel %vm842_vm0, %v2381_v40, 0.0 }
 0x301   : > { %v2220_v44 = vpop.xlane.xlu1 %2219 }
 0x302   : > { %v4208_v12 = vsub.f32 %v3998_v28, %v2308_v54  ;;  %v2309_v16 = vmul.f32 0.03125, %v2220_v44  ;;  %v2405_v1 = vsel %vm842_vm0, %v2371_v38, 0.0  ;;  %2439 = vadd.xlane.f32.xlu0 %v2438_v51  ;;  %v2383_v28 = vmul.f32 %v4204_v43, %v4204_v43 }
 0x303   : > { %v2223_v47 = vpop.xlane.xlu0 %2222  ;;  %2406 = vadd.xlane.f32.xlu1 %v2405_v1 }
 0x304   : > { %v2310_v39 = vmul.f32 0.03125, %v2223_v47  ;;  %v2372_v27 = vmul.f32 %v4208_v12, %v4208_v12  ;;  %v4216_v13 = vsub.f32 %v4012_v17, %v2309_v16  ;;  %v2441_v11 = vsel %vm842_vm0, %v2383_v28, 0.0 }
 0x305   : > { %v2226_v42 = vpop.xlane.xlu1 %2225 }
 0x306   : > { %v4221_v60 = vsub.f32 %v4020_v0, %v2310_v39  ;;  %v2311_v61 = vmul.f32 0.03125, %v2226_v42  ;;  %v2408_v9 = vsel %vm842_vm0, %v2372_v27, 0.0  ;;  %v2373_v32 = vmul.f32 %v4216_v13, %v4216_v13 }
 0x307   : > { %v2253_v41 = vpop.xlane.xlu0 %2252  ;;  %2436 = vadd.xlane.f32.xlu1 %v2435_v5  ;;  %2409 = vadd.xlane.f32.xlu0 %v2408_v9 }
 0x308   : > { %v2320_v20 = vmul.f32 0.03125, %v2253_v41  ;;  %v2374_v17 = vmul.f32 %v4221_v60, %v4221_v60  ;;  %v4231_v0 = vsub.f32 %v4030_v31, %v2311_v61  ;;  %v2411_v31 = vsel %vm842_vm0, %v2373_v32, 0.0 }
 0x309   : > { %v2256_v58 = vpop.xlane.xlu1 %2255 }
 0x30a   : > { %v4234_v19 = vsub.f32 %v4039_v30, %v2320_v20  ;;  %v2321_v10 = vmul.f32 0.03125, %v2256_v58  ;;  %v2414_v22 = vsel %vm842_vm0, %v2374_v17, 0.0  ;;  %v2375_v54 = vmul.f32 %v4231_v0, %v4231_v0 }
 0x30b   : > { %v2283_v46 = vpop.xlane.xlu0 %2282  ;;  %2442 = vadd.xlane.f32.xlu1 %v2441_v11  ;;  %2415 = vadd.xlane.f32.xlu0 %v2414_v22 }
 0x30c   : > { %v2330_v33 = vmul.f32 0.03125, %v2283_v46  ;;  %v2384_v49 = vmul.f32 %v4234_v19, %v4234_v19  ;;  %v4240_v59 = vsub.f32 %v4049_v50, %v2321_v10  ;;  %v2417_v47 = vsel %vm842_vm0, %v2375_v54, 0.0 }
 0x30d   : > { %v2286_v25 = vpop.xlane.xlu1 %2285 }
 0x30e   : > { %v4244_v52 = vsub.f32 %v4062_v48, %v2330_v33  ;;  %v2331_v30 = vmul.f32 0.03125, %v2286_v25  ;;  %v2444_v26 = vsel %vm842_vm0, %v2384_v49, 0.0  ;;  %v2385_v48 = vmul.f32 %v4240_v59, %v4240_v59 }
 0x30f   : > { %v2229_v38 = vpop.xlane.xlu0 %2228  ;;  %2412 = vadd.xlane.f32.xlu1 %v2411_v31  ;;  %2445 = vadd.xlane.f32.xlu0 %v2444_v26 }
 0x310   : > { %v2312_v44 = vmul.f32 0.03125, %v2229_v38  ;;  %v2394_v50 = vmul.f32 %v4244_v52, %v4244_v52  ;;  %v4252_v51 = vsub.f32 %v4071_v3, %v2331_v30  ;;  %v2447_v61 = vsel %vm842_vm0, %v2385_v48, 0.0 }
 0x311   : > { %v2232_v16 = vpop.xlane.xlu1 %2231 }
 0x312   : > { %v4257_v1 = vsub.f32 %v4081_v21, %v2312_v44  ;;  %v2313_v40 = vmul.f32 0.03125, %v2232_v16  ;;  %v2474_v39 = vsel %vm842_vm0, %v2394_v50, 0.0  ;;  %v2395_v5 = vmul.f32 %v4252_v51, %v4252_v51 }
 0x313   : > { %2418 = vadd.xlane.f32.xlu1 %v2417_v47  ;;  %2475 = vadd.xlane.f32.xlu0 %v2474_v39  ;;  %v2259_v27 = vpop.xlane.xlu0 %2258 }
 0x314   : > { %v2322_v42 = vmul.f32 0.03125, %v2259_v27  ;;  %v2376_v3 = vmul.f32 %v4257_v1, %v4257_v1  ;;  %v4267_v21 = vsub.f32 %v4087_v18, %v2313_v40  ;;  %v2477_v18 = vsel %vm842_vm0, %v2395_v5, 0.0 }
 0x315   : > { %v2262_v28 = vpop.xlane.xlu1 %2261 }
 0x316   : > { %v4270_v9 = vsub.f32 %v4094_v8, %v2322_v42  ;;  %v2323_v41 = vmul.f32 0.03125, %v2262_v28  ;;  %v2420_v20 = vsel %vm842_vm0, %v2376_v3, 0.0  ;;  %v2377_v33 = vmul.f32 %v4267_v21, %v4267_v21 }
 0x317   : > { %2448 = vadd.xlane.f32.xlu1 %v2447_v61  ;;  %2421 = vadd.xlane.f32.xlu0 %v2420_v20  ;;  %v2289_v17 = vpop.xlane.xlu0 %2288 }
 0x318   : > { %v2332_v58 = vmul.f32 0.03125, %v2289_v17  ;;  %v2386_v11 = vmul.f32 %v4270_v9, %v4270_v9  ;;  %v4276_v32 = vsub.f32 %v4100_v24, %v2323_v41  ;;  %v2423_v38 = vsel %vm842_vm0, %v2377_v33, 0.0 }
 0x319   : > { %v2292_v10 = vpop.xlane.xlu1 %2291 }
 0x31a   : > { %v4280_v22 = vsub.f32 %v4105_v56, %v2332_v58  ;;  %v2333_v8 = vmul.f32 0.03125, %v2292_v10  ;;  %v2450_v46 = vsel %vm842_vm0, %v2386_v11, 0.0  ;;  %v2387_v56 = vmul.f32 %v4276_v32, %v4276_v32 }
 0x31b   : > { %2478 = vadd.xlane.f32.xlu1 %v2477_v18  ;;  %2451 = vadd.xlane.f32.xlu0 %v2450_v46  ;;  %v2295_v49 = vpop.xlane.xlu0 %2294 }
 0x31c   : > { %v2334_v25 = vmul.f32 0.03125, %v2295_v49  ;;  %v2396_v24 = vmul.f32 %v4280_v22, %v4280_v22  ;;  %v4288_v31 = vsub.f32 %v4110_v2, %v2333_v8  ;;  %v2453_v40 = vsel %vm842_vm0, %v2387_v56, 0.0 }
 0x31d   : > { %v2298_v30 = vpop.xlane.xlu1 %2297 }
 0x31e   : > { %v4293_v26 = vsub.f32 %v4115_v15, %v2334_v25  ;;  %v2335_v54 = vmul.f32 0.03125, %v2298_v30  ;;  %v2480_v44 = vsel %vm842_vm0, %v2396_v24, 0.0  ;;  %v2397_v47 = vmul.f32 %v4288_v31, %v4288_v31 }
 0x31f   : > { %2424 = vadd.xlane.f32.xlu1 %v2423_v38  ;;  %2481 = vadd.xlane.f32.xlu0 %v2480_v44  ;;  %v2265_v50 = vpop.xlane.xlu0 %2264 }
 0x320   : > { %v2324_v16 = vmul.f32 0.03125, %v2265_v50  ;;  %v2398_v2 = vmul.f32 %v4293_v26, %v4293_v26  ;;  %v4303_v15 = vsub.f32 %v4120_v34, %v2335_v54  ;;  %v2483_v34 = vsel %vm842_vm0, %v2397_v47, 0.0 }
 0x321   : > { %v2268_v48 = vpop.xlane.xlu1 %2267 }
 0x322   : > { %v4306_v39 = vsub.f32 %v4125_v57, %v2324_v16  ;;  %v2325_v27 = vmul.f32 0.03125, %v2268_v48  ;;  %v2486_v42 = vsel %vm842_vm0, %v2398_v2, 0.0  ;;  %v2399_v58 = vmul.f32 %v4303_v15, %v4303_v15 }
 0x323   : > { %2454 = vadd.xlane.f32.xlu1 %v2453_v40  ;;  %2487 = vadd.xlane.f32.xlu0 %v2486_v42  ;;  %v2271_v3 = vpop.xlane.xlu0 %2270 }
 0x324   : > { %v2326_v28 = vmul.f32 0.03125, %v2271_v3  ;;  %v2388_v61 = vmul.f32 %v4306_v39, %v4306_v39  ;;  %v4312_v5 = vsub.f32 %v4130_v63, %v2325_v27  ;;  %v2489_v49 = vsel %vm842_vm0, %v2399_v58, 0.0 }
 0x325   : > { %v2274_v41 = vpop.xlane.xlu1 %2273 }
 0x326   : > { %v4316_v20 = vsub.f32 %v4135_v29, %v2326_v28  ;;  %v2327_v57 = vmul.f32 0.03125, %v2274_v41  ;;  %v2456_v17 = vsel %vm842_vm0, %v2388_v61, 0.0  ;;  %v2389_v29 = vmul.f32 %v4312_v5, %v4312_v5 }
 0x327   : > { %2484 = vadd.xlane.f32.xlu1 %v2483_v34  ;;  %2457 = vadd.xlane.f32.xlu0 %v2456_v17  ;;  %v2277_v11 = vpop.xlane.xlu0 %2276 }
 0x328   : > { %v2328_v10 = vmul.f32 0.03125, %v2277_v11  ;;  %v2390_v63 = vmul.f32 %v4316_v20, %v4316_v20  ;;  %v4324_v18 = vsub.f32 %v4140_v35, %v2327_v57  ;;  %v2459_v54 = vsel %vm842_vm0, %v2389_v29, 0.0 }
 0x329   : > { %v2280_v8 = vpop.xlane.xlu1 %2279 }
 0x32a   : > { %v4329_v46 = vsub.f32 %v4145_v37, %v2328_v10  ;;  %v2329_v33 = vmul.f32 0.03125, %v2280_v8  ;;  %v2462_v25 = vsel %vm842_vm0, %v2390_v63, 0.0  ;;  %v2391_v38 = vmul.f32 %v4324_v18, %v4324_v18 }
 0x32b   : > { %2490 = vadd.xlane.f32.xlu1 %v2489_v49  ;;  %2463 = vadd.xlane.f32.xlu0 %v2462_v25  ;;  %v2301_v24 = vpop.xlane.xlu0 %2300 }
 0x32c   : > { %v2336_v30 = vmul.f32 0.03125, %v2301_v24  ;;  %v2392_v35 = vmul.f32 %v4329_v46, %v4329_v46  ;;  %v4339_v37 = vsub.f32 %v4150_v55, %v2329_v33  ;;  %v2465_v40 = vsel %vm842_vm0, %v2391_v38, 0.0 }
 0x32d   : > { %v2304_v56 = vpop.xlane.xlu1 %2303 }
 0x32e   : > { %v4342_v44 = vsub.f32 %v4155_v4, %v2336_v30  ;;  %v2337_v50 = vmul.f32 0.03125, %v2304_v56  ;;  %v2468_v16 = vsel %vm842_vm0, %v2392_v35, 0.0  ;;  %v2393_v55 = vmul.f32 %v4339_v37, %v4339_v37  ;;  %v4361_v35 = vld [vmem:[%s4648_s7] ss:$0 sm:$0xff] }
 0x32f   : > { %2460 = vadd.xlane.f32.xlu1 %v2459_v54  ;;  %2469 = vadd.xlane.f32.xlu0 %v2468_v16 }
 0x330   : > { %v2400_v2 = vmul.f32 %v4342_v44, %v4342_v44  ;;  %v4348_v48 = vsub.f32 %v4160_v23, %v2337_v50  ;;  %v2471_v4 = vsel %vm842_vm0, %v2393_v55, 0.0 }
 0x332   : > { %v2492_v47 = vsel %vm842_vm0, %v2400_v2, 0.0  ;;  %v2401_v27 = vmul.f32 %v4348_v48, %v4348_v48  ;;  %v4367_v2 = vld [vmem:[%s4649_s8] ss:$0 sm:$0xff] }
 0x333   : > { %2466 = vadd.xlane.f32.xlu1 %v2465_v40  ;;  %2493 = vadd.xlane.f32.xlu0 %v2492_v47 }
 0x334   : > { %v2495_v42 = vsel %vm842_vm0, %v2401_v27, 0.0 }
 0x337   : > { %2472 = vadd.xlane.f32.xlu1 %v2471_v4 }
 0x33b   : > { %2496 = vadd.xlane.f32.xlu1 %v2495_v42 }
 0x383   : > { %v2428_v23 = vpop.xlane.xlu0 %2427 }
 0x384   : > { %v2506_v3 = vmul.f32 0.03125, %v2428_v23 }
 0x386   : > { %v2538_v28 = vadd.f32 1e-05, %v2506_v3 }
 0x387   : > { %v2404_v61 = vpop.xlane.xlu0 %2403 }
 0x388   : > { %3369 = vrsqrt.f32 %v2538_v28  ;;  %v2498_v41 = vmul.f32 0.03125, %v2404_v61 }
 0x38a   : > { %v2431_v34 = vpop.xlane.xlu1 %2430  ;;  %v2530_v57 = vadd.f32 1e-05, %v2498_v41  ;;  %v4375_v41 = vld [vmem:[%s4650_s9] ss:$0 sm:$0xff] }
 0x38b   : > { %v2507_v17 = vmul.f32 0.03125, %v2431_v34  ;;  %v2434_v58 = vpop.xlane.xlu0 %2433 }
 0x38c   : > { %3371 = vrsqrt.f32 %v2530_v57  ;;  %v2508_v10 = vmul.f32 0.03125, %v2434_v58 }
 0x38d   : > { %v2539_v11 = vadd.f32 1e-05, %v2507_v17 }
 0x38e   : > { %v2540_v63 = vadd.f32 1e-05, %v2508_v10 }
 0x38f   : > { %3373 = vrsqrt.f32 %v2539_v11  ;;  %v2440_v29 = vpop.xlane.xlu0 %2439 }
 0x390   : > { %v2407_v8 = vpop.xlane.xlu1 %2406  ;;  %3375 = vrsqrt.f32 %v2540_v63  ;;  %v2510_v49 = vmul.f32 0.03125, %v2440_v29 }
 0x391   : > { %v2499_v33 = vmul.f32 0.03125, %v2407_v8 }
 0x392   : > { %v3370_v25 = vpop.eup %3369  ;;  %v2542_v30 = vadd.f32 1e-05, %v2510_v49 }
 0x393   : > { %v2531_v24 = vadd.f32 1e-05, %v2499_v33  ;;  %v2602_v38 = vmul.f32 %v3370_v25, %v4167_v53 }
 0x394   : > { %v2437_v56 = vpop.xlane.xlu1 %2436  ;;  %v2410_v54 = vpop.xlane.xlu0 %2409 }
 0x395   : > { %3377 = vrsqrt.f32 %v2531_v24  ;;  %v2509_v50 = vmul.f32 0.03125, %v2437_v56  ;;  %v2500_v16 = vmul.f32 0.03125, %v2410_v54  ;;  %v2641_v40 = vmul.f32 %v4361_v35, %v2602_v38 }
 0x396   : > { %3379 = vrsqrt.f32 %v2542_v30  ;;  %v3372_v47 = vpop.eup %3371 }
 0x397   : > { %v2541_v55 = vadd.f32 1e-05, %v2509_v50  ;;  %v2532_v4 = vadd.f32 1e-05, %v2500_v16  ;;  %v2680_v23 = vadd.f32 %v4367_v2, %v2641_v40  ;;  %v2594_v53 = vmul.f32 %v3372_v47, %v4170_v36 }
 0x398   : > { %v2443_v27 = vpop.xlane.xlu1 %2442  ;;  %v2416_v42 = vpop.xlane.xlu0 %2415 }
 0x399   : > { %v3374_v3 = vpop.eup %3373  ;;  %3381 = vrsqrt.f32 %v2541_v55  ;;  %v2511_v28 = vmul.f32 0.03125, %v2443_v27  ;;  %v2502_v61 = vmul.f32 0.03125, %v2416_v42  ;;  %v2712_v34 = vmax.f32 %v2680_v23, 0.0 }
 0x39a   : > { %3383 = vrsqrt.f32 %v2532_v4  ;;  %v2633_v57 = vmul.f32 %v4361_v35, %v2594_v53  ;;  %v2603_v17 = vmul.f32 %v3374_v3, %v4181_v45  ;;  %v3376_v58 = vpop.eup %3375 }
 0x39b   : > { %v2543_v11 = vadd.f32 1e-05, %v2511_v28  ;;  %v2534_v10 = vadd.f32 1e-05, %v2502_v61  ;;  %v2751_v8 = vmul.f32 %v4375_v41, %v2712_v34  ;;  %v2604_v49 = vmul.f32 %v3376_v58, %v4175_v62 }
 0x39c   : > { %v2413_v63 = vpop.xlane.xlu1 %2412  ;;  %v2446_v36 = vpop.xlane.xlu0 %2445  ;;  %v2672_v29 = vadd.f32 %v4367_v2, %v2633_v57  ;;  %v2642_v33 = vmul.f32 %v4361_v35, %v2603_v17 }
 0x39d   : > { %3385 = vrsqrt.f32 %v2543_v11  ;;  %v2501_v25 = vmul.f32 0.03125, %v2413_v63  ;;  %v2512_v24 = vmul.f32 0.03125, %v2446_v36  ;;  %v2799_v30 = vsel %vm842_vm0, %v2751_v8, 0.0 }
 0x39e   : > { %v2704_v56 = vmax.f32 %v2672_v29, 0.0  ;;  %v2681_v45 = vadd.f32 %v4367_v2, %v2642_v33  ;;  %3387 = vrsqrt.f32 %v2534_v10  ;;  %2800 = vadd.xlane.f32.xlu0 %v2799_v30  ;;  %v2643_v16 = vmul.f32 %v4361_v35, %v2604_v49 }
 0x39f   : > { %v3378_v54 = vpop.eup %3377  ;;  %v2533_v38 = vadd.f32 1e-05, %v2501_v25  ;;  %v2544_v50 = vadd.f32 1e-05, %v2512_v24 }
 0x3a0   : > { %v3380_v40 = vpop.eup %3379  ;;  %v2419_v47 = vpop.xlane.xlu1 %2418  ;;  %v2743_v62 = vmul.f32 %v4375_v41, %v2704_v56  ;;  %v2713_v4 = vmax.f32 %v2681_v45, 0.0  ;;  %v2595_v27 = vmul.f32 %v3378_v54, %v4198_v14  ;;  %v2682_v53 = vadd.f32 %v4367_v2, %v2643_v16 }
 0x3a1   : > { %v2476_v55 = vpop.xlane.xlu0 %2475  ;;  %3389 = vrsqrt.f32 %v2533_v38  ;;  %v2503_v42 = vmul.f32 0.03125, %v2419_v47  ;;  %v2606_v11 = vmul.f32 %v3380_v40, %v4185_v7 }
 0x3a2   : > { %v2522_v23 = vmul.f32 0.03125, %v2476_v55  ;;  %3391 = vrsqrt.f32 %v2544_v50  ;;  %v2775_v3 = vsel %vm842_vm0, %v2743_v62, 0.0  ;;  %v2752_v28 = vmul.f32 %v4375_v41, %v2713_v4 }
 0x3a3   : > { %v2634_v61 = vmul.f32 %v4361_v35, %v2595_v27  ;;  %v3382_v34 = vpop.eup %3381  ;;  %v2535_v57 = vadd.f32 1e-05, %v2503_v42  ;;  %2776 = vadd.xlane.f32.xlu0 %v2775_v3  ;;  %v2714_v58 = vmax.f32 %v2682_v53, 0.0  ;;  %v2645_v30 = vmul.f32 %v4361_v35, %v2606_v11 }
 0x3a4   : > { %v2554_v17 = vadd.f32 1e-05, %v2522_v23  ;;  %v3384_v14 = vpop.eup %3383  ;;  %v2802_v10 = vsel %vm842_vm0, %v2752_v28, 0.0  ;;  %v2449_v63 = vpop.xlane.xlu1 %2448  ;;  %v2605_v29 = vmul.f32 %v3382_v34, %v4195_v6 }
 0x3a5   : > { %v2422_v36 = vpop.xlane.xlu0 %2421  ;;  %v2673_v8 = vadd.f32 %v4367_v2, %v2634_v61  ;;  %3393 = vrsqrt.f32 %v2535_v57  ;;  %2803 = vadd.xlane.f32.xlu1 %v2802_v10  ;;  %v2513_v33 = vmul.f32 0.03125, %v2449_v63  ;;  %v2753_v25 = vmul.f32 %v4375_v41, %v2714_v58 }
 0x3a6   : > { %v2504_v49 = vmul.f32 0.03125, %v2422_v36  ;;  %3395 = vrsqrt.f32 %v2554_v17  ;;  %v2644_v7 = vmul.f32 %v4361_v35, %v2605_v29  ;;  %v2596_v50 = vmul.f32 %v3384_v14, %v4208_v12 }
 0x3a7   : > { %v2705_v24 = vmax.f32 %v2673_v8, 0.0  ;;  %v3386_v56 = vpop.eup %3385  ;;  %v2545_v45 = vadd.f32 1e-05, %v2513_v33  ;;  %v2805_v38 = vsel %vm842_vm0, %v2753_v25, 0.0  ;;  %v2684_v47 = vadd.f32 %v4367_v2, %v2645_v30 }
 0x3a8   : > { %v2536_v54 = vadd.f32 1e-05, %v2504_v49  ;;  %2806 = vadd.xlane.f32.xlu0 %v2805_v38  ;;  %v2479_v6 = vpop.xlane.xlu1 %2478  ;;  %v2683_v55 = vadd.f32 %v4367_v2, %v2644_v7  ;;  %v2607_v62 = vmul.f32 %v3386_v56, %v4204_v43  ;;  %v3388_v4 = vpop.eup %3387  ;;  %v2635_v23 = vmul.f32 %v4361_v35, %v2596_v50 }
 0x3a9   : > { %v2452_v16 = vpop.xlane.xlu0 %2451  ;;  %v2744_v40 = vmul.f32 %v4375_v41, %v2705_v24  ;;  %3397 = vrsqrt.f32 %v2545_v45  ;;  %v2523_v27 = vmul.f32 0.03125, %v2479_v6  ;;  %v2716_v53 = vmax.f32 %v2684_v47, 0.0 }
 0x3aa   : > { %v2514_v42 = vmul.f32 0.03125, %v2452_v16  ;;  %3399 = vrsqrt.f32 %v2536_v54  ;;  %v2715_v3 = vmax.f32 %v2683_v55, 0.0  ;;  %v2674_v57 = vadd.f32 %v4367_v2, %v2635_v23 }
 0x3ab   : > { %v2778_v12 = vsel %vm842_vm0, %v2744_v40, 0.0  ;;  %v3390_v28 = vpop.eup %3389  ;;  %v2555_v61 = vadd.f32 1e-05, %v2523_v27  ;;  %v2646_v17 = vmul.f32 %v4361_v35, %v2607_v62  ;;  %v2755_v58 = vmul.f32 %v4375_v41, %v2716_v53 }
 0x3ac   : > { %v2546_v34 = vadd.f32 1e-05, %v2514_v42  ;;  %2779 = vadd.xlane.f32.xlu1 %v2778_v12  ;;  %v3392_v43 = vpop.eup %3391  ;;  %v2425_v11 = vpop.xlane.xlu1 %2424  ;;  %v2754_v10 = vmul.f32 %v4375_v41, %v2715_v3  ;;  %v2598_v63 = vmul.f32 %v3388_v4, %v4221_v60  ;;  %v2597_v36 = vmul.f32 %v3390_v28, %v4216_v13 }
 0x3ad   : > { %v2482_v14 = vpop.xlane.xlu0 %2481  ;;  %3401 = vrsqrt.f32 %v2555_v61  ;;  %v2505_v8 = vmul.f32 0.03125, %v2425_v11  ;;  %v2706_v33 = vmax.f32 %v2674_v57, 0.0  ;;  %v2811_v49 = vsel %vm842_vm0, %v2755_v58, 0.0 }
 0x3ae   : > { %v2524_v29 = vmul.f32 0.03125, %v2482_v14  ;;  %3403 = vrsqrt.f32 %v2546_v34  ;;  %v2808_v25 = vsel %vm842_vm0, %v2754_v10, 0.0  ;;  %v2685_v24 = vadd.f32 %v4367_v2, %v2646_v17  ;;  %2812 = vadd.xlane.f32.xlu0 %v2811_v49 }
 0x3af   : > { %v3394_v30 = vpop.eup %3393  ;;  %v2537_v7 = vadd.f32 1e-05, %v2505_v8  ;;  %v2745_v60 = vmul.f32 %v4375_v41, %v2706_v33  ;;  %v2637_v13 = vmul.f32 %v4361_v35, %v2598_v63  ;;  %v2636_v6 = vmul.f32 %v4361_v35, %v2597_v36 }
 0x3b0   : > { %v2556_v56 = vadd.f32 1e-05, %v2524_v29  ;;  %2809 = vadd.xlane.f32.xlu1 %v2808_v25  ;;  %v3396_v45 = vpop.eup %3395  ;;  %v2455_v54 = vpop.xlane.xlu1 %2454  ;;  %v2717_v50 = vmax.f32 %v2685_v24, 0.0  ;;  %v2608_v16 = vmul.f32 %v3392_v43, %v4234_v19  ;;  %v2599_v40 = vmul.f32 %v3394_v30, %v4231_v0 }
 0x3b1   : > { %v2488_v38 = vpop.xlane.xlu0 %2487  ;;  %3405 = vrsqrt.f32 %v2537_v7  ;;  %v2781_v47 = vsel %vm842_vm0, %v2745_v60, 0.0  ;;  %v2515_v55 = vmul.f32 0.03125, %v2455_v54  ;;  %v2676_v27 = vadd.f32 %v4367_v2, %v2637_v13 }
 0x3b2   : > { %v2526_v62 = vmul.f32 0.03125, %v2488_v38  ;;  %3407 = vrsqrt.f32 %v2556_v56  ;;  %v2756_v4 = vmul.f32 %v4375_v41, %v2717_v50  ;;  %v2675_v42 = vadd.f32 %v4367_v2, %v2636_v6  ;;  %2782 = vadd.xlane.f32.xlu0 %v2781_v47 }
 0x3b3   : > { %v3398_v23 = vpop.eup %3397  ;;  %v2547_v12 = vadd.f32 1e-05, %v2515_v55  ;;  %v2647_v19 = vmul.f32 %v4361_v35, %v2608_v16  ;;  %v2638_v0 = vmul.f32 %v4361_v35, %v2599_v40  ;;  %v2708_v61 = vmax.f32 %v2676_v27, 0.0 }
 0x3b4   : > { %v2558_v53 = vadd.f32 1e-05, %v2526_v62  ;;  %v3400_v3 = vpop.eup %3399  ;;  %v2814_v28 = vsel %vm842_vm0, %v2756_v4, 0.0  ;;  %v2485_v34 = vpop.xlane.xlu1 %2484  ;;  %v2707_v17 = vmax.f32 %v2675_v42, 0.0  ;;  %v2618_v43 = vmul.f32 %v3396_v45, %v4244_v52 }
 0x3b5   : > { %v2458_v57 = vpop.xlane.xlu0 %2457  ;;  %3409 = vrsqrt.f32 %v2547_v12  ;;  %2815 = vadd.xlane.f32.xlu1 %v2814_v28  ;;  %v2525_v58 = vmul.f32 0.03125, %v2485_v34  ;;  %v2686_v14 = vadd.f32 %v4367_v2, %v2647_v19  ;;  %v2747_v10 = vmul.f32 %v4375_v41, %v2708_v61 }
 0x3b6   : > { %v2516_v11 = vmul.f32 0.03125, %v2458_v57  ;;  %3411 = vrsqrt.f32 %v2558_v53  ;;  %v2746_v63 = vmul.f32 %v4375_v41, %v2707_v17  ;;  %v2677_v36 = vadd.f32 %v4367_v2, %v2638_v0 }
 0x3b7   : > { %v3402_v8 = vpop.eup %3401  ;;  %v2557_v29 = vadd.f32 1e-05, %v2525_v58  ;;  %v2718_v49 = vmax.f32 %v2686_v14, 0.0  ;;  %v2657_v25 = vmul.f32 %v4361_v35, %v2618_v43  ;;  %v2787_v24 = vsel %vm842_vm0, %v2747_v10, 0.0 }
 0x3b8   : > { %v2548_v33 = vadd.f32 1e-05, %v2516_v11  ;;  %v3404_v52 = vpop.eup %3403  ;;  %v2784_v30 = vsel %vm842_vm0, %v2746_v63, 0.0  ;;  %v2491_v7 = vpop.xlane.xlu1 %2490  ;;  %v2709_v60 = vmax.f32 %v2677_v36, 0.0  ;;  %v2609_v13 = vmul.f32 %v3398_v23, %v4240_v59  ;;  %2788 = vadd.xlane.f32.xlu0 %v2787_v24 }
 0x3b9   : > { %v2464_v56 = vpop.xlane.xlu0 %2463  ;;  %3413 = vrsqrt.f32 %v2557_v29  ;;  %2785 = vadd.xlane.f32.xlu1 %v2784_v30  ;;  %v2757_v45 = vmul.f32 %v4375_v41, %v2718_v49  ;;  %v2527_v54 = vmul.f32 0.03125, %v2491_v7  ;;  %v2696_v6 = vadd.f32 %v4367_v2, %v2657_v25 }
 0x3ba   : > { %v2518_v38 = vmul.f32 0.03125, %v2464_v56  ;;  %3415 = vrsqrt.f32 %v2548_v33  ;;  %v2748_v50 = vmul.f32 %v4375_v41, %v2709_v60  ;;  %v2648_v16 = vmul.f32 %v4361_v35, %v2609_v13 }
 0x3bb   : > { %v3406_v40 = vpop.eup %3405  ;;  %v2817_v47 = vsel %vm842_vm0, %v2757_v45, 0.0  ;;  %v2559_v55 = vadd.f32 1e-05, %v2527_v54  ;;  %v2600_v59 = vmul.f32 %v3400_v3, %v4257_v1  ;;  %v2728_v42 = vmax.f32 %v2696_v6, 0.0 }
 0x3bc   : > { %v2550_v62 = vadd.f32 1e-05, %v2518_v38  ;;  %v3408_v4 = vpop.eup %3407  ;;  %v2790_v27 = vsel %vm842_vm0, %v2748_v50, 0.0  ;;  %v2461_v23 = vpop.xlane.xlu1 %2460  ;;  %v2687_v53 = vadd.f32 %v4367_v2, %v2648_v16  ;;  %v2619_v19 = vmul.f32 %v3402_v8, %v4252_v51  ;;  %2818 = vadd.xlane.f32.xlu0 %v2817_v47 }
 0x3bd   : > { %v2470_v12 = vpop.xlane.xlu0 %2469  ;;  %3417 = vrsqrt.f32 %v2559_v55  ;;  %2791 = vadd.xlane.f32.xlu1 %v2790_v27  ;;  %v2517_v0 = vmul.f32 0.03125, %v2461_v23  ;;  %v2639_v61 = vmul.f32 %v4361_v35, %v2600_v59  ;;  %v2767_v1 = vmul.f32 %v4375_v41, %v2728_v42 }
 0x3be   : > { %v2520_v28 = vmul.f32 0.03125, %v2470_v12  ;;  %3419 = vrsqrt.f32 %v2550_v62  ;;  %v2719_v3 = vmax.f32 %v2687_v53, 0.0  ;;  %v2658_v34 = vmul.f32 %v4361_v35, %v2619_v19 }
 0x3bf   : > { %v3410_v57 = vpop.eup %3409  ;;  %v2549_v17 = vadd.f32 1e-05, %v2517_v0  ;;  %v2678_v58 = vadd.f32 %v4367_v2, %v2639_v61  ;;  %v2610_v51 = vmul.f32 %v3404_v52, %v4270_v9  ;;  %v2847_v14 = vsel %vm842_vm0, %v2767_v1, 0.0 }
 0x3c0   : > { %v2552_v43 = vadd.f32 1e-05, %v2520_v28  ;;  %v3412_v11 = vpop.eup %3411  ;;  %v2758_v10 = vmul.f32 %v4375_v41, %v2719_v3  ;;  %v2467_v63 = vpop.xlane.xlu1 %2466  ;;  %v2697_v8 = vadd.f32 %v4367_v2, %v2658_v34  ;;  %v2601_v29 = vmul.f32 %v3406_v40, %v4267_v21  ;;  %2848 = vadd.xlane.f32.xlu0 %v2847_v14 }
 0x3c1   : > { %v2494_v36 = vpop.xlane.xlu0 %2493  ;;  %3421 = vrsqrt.f32 %v2549_v17  ;;  %v2710_v33 = vmax.f32 %v2678_v58, 0.0  ;;  %v2519_v49 = vmul.f32 0.03125, %v2467_v63  ;;  %v2649_v52 = vmul.f32 %v4361_v35, %v2610_v51 }
 0x3c2   : > { %v2528_v25 = vmul.f32 0.03125, %v2494_v36  ;;  %3423 = vrsqrt.f32 %v2552_v43  ;;  %v2820_v24 = vsel %vm842_vm0, %v2758_v10, 0.0  ;;  %v2729_v9 = vmax.f32 %v2697_v8, 0.0 }
 0x3c3   : > { %v3414_v30 = vpop.eup %3413  ;;  %2821 = vadd.xlane.f32.xlu1 %v2820_v24  ;;  %v2749_v7 = vmul.f32 %v4375_v41, %v2710_v33  ;;  %v2551_v56 = vadd.f32 1e-05, %v2519_v49  ;;  %v2640_v13 = vmul.f32 %v4361_v35, %v2601_v29  ;;  %v2688_v54 = vadd.f32 %v4367_v2, %v2649_v52 }
 0x3c4   : > { %v2560_v60 = vadd.f32 1e-05, %v2528_v25  ;;  %v3416_v21 = vpop.eup %3415  ;;  %v2768_v45 = vmul.f32 %v4375_v41, %v2729_v9  ;;  %v2473_v38 = vpop.xlane.xlu1 %2472  ;;  %v2620_v50 = vmul.f32 %v3408_v4, %v4280_v22  ;;  %v2611_v6 = vmul.f32 %v3410_v57, %v4276_v32 }
 0x3c5   : > { %v2793_v16 = vsel %vm842_vm0, %v2749_v7, 0.0  ;;  %3425 = vrsqrt.f32 %v2551_v56  ;;  %v2521_v40 = vmul.f32 0.03125, %v2473_v38  ;;  %v2679_v47 = vadd.f32 %v4367_v2, %v2640_v13 }
 0x3c6   : > { %2794 = vadd.xlane.f32.xlu0 %v2793_v16  ;;  %3427 = vrsqrt.f32 %v2560_v60  ;;  %v2850_v55 = vsel %vm842_vm0, %v2768_v45, 0.0  ;;  %v2720_v62 = vmax.f32 %v2688_v54, 0.0  ;;  %v2659_v59 = vmul.f32 %v4361_v35, %v2620_v50 }
 0x3c7   : > { %v3418_v27 = vpop.eup %3417  ;;  %2851 = vadd.xlane.f32.xlu1 %v2850_v55  ;;  %v2553_v42 = vadd.f32 1e-05, %v2521_v40  ;;  %v2711_v23 = vmax.f32 %v2679_v47, 0.0  ;;  %v2650_v22 = vmul.f32 %v4361_v35, %v2611_v6  ;;  %v2622_v32 = vmul.f32 %v3412_v11, %v4293_v26 }
 0x3c8   : > { %v3420_v4 = vpop.eup %3419  ;;  %v2759_v12 = vmul.f32 %v4375_v41, %v2720_v62  ;;  %v2698_v53 = vadd.f32 %v4367_v2, %v2659_v59  ;;  %v2497_v19 = vpop.xlane.xlu1 %2496  ;;  %v2621_v0 = vmul.f32 %v3414_v30, %v4288_v31  ;;  %v2612_v28 = vmul.f32 %v3416_v21, %v4306_v39 }
 0x3c9   : > { %3429 = vrsqrt.f32 %v2553_v42  ;;  %v2750_v61 = vmul.f32 %v4375_v41, %v2711_v23  ;;  %v2529_v1 = vmul.f32 0.03125, %v2497_v19  ;;  %v2689_v3 = vadd.f32 %v4367_v2, %v2650_v22 }
 0x3ca   : > { %v2823_v34 = vsel %vm842_vm0, %v2759_v12, 0.0  ;;  %v2730_v57 = vmax.f32 %v2698_v53, 0.0  ;;  %v2661_v26 = vmul.f32 %v4361_v35, %v2622_v32  ;;  %v2660_v17 = vmul.f32 %v4361_v35, %v2621_v0 }
 0x3cb   : > { %v3422_v43 = vpop.eup %3421  ;;  %2824 = vadd.xlane.f32.xlu0 %v2823_v34  ;;  %v2796_v58 = vsel %vm842_vm0, %v2750_v61, 0.0  ;;  %v2561_v31 = vadd.f32 1e-05, %v2529_v1  ;;  %v2721_v51 = vmax.f32 %v2689_v3, 0.0  ;;  %v2651_v39 = vmul.f32 %v4361_v35, %v2612_v28 }
 0x3cc   : > { %v3424_v11 = vpop.eup %3423  ;;  %2797 = vadd.xlane.f32.xlu1 %v2796_v58  ;;  %v2769_v14 = vmul.f32 %v4375_v41, %v2730_v57  ;;  %v2700_v10 = vadd.f32 %v4367_v2, %v2661_v26  ;;  %v2699_v63 = vadd.f32 %v4367_v2, %v2660_v17  ;;  %v2623_v36 = vmul.f32 %v3418_v27, %v4303_v15 }
 0x3cd   : > { %3431 = vrsqrt.f32 %v2561_v31  ;;  %v2760_v8 = vmul.f32 %v4375_v41, %v2721_v51  ;;  %v2690_v29 = vadd.f32 %v4367_v2, %v2651_v39  ;;  %v2614_v33 = vmul.f32 %v3420_v4, %v4316_v20 }
 0x3ce   : > { %v2853_v49 = vsel %vm842_vm0, %v2769_v14, 0.0  ;;  %v2732_v25 = vmax.f32 %v2700_v10, 0.0  ;;  %v2731_v24 = vmax.f32 %v2699_v63, 0.0  ;;  %v2662_v9 = vmul.f32 %v4361_v35, %v2623_v36 }
 0x3cf   : > { %v3426_v52 = vpop.eup %3425  ;;  %2854 = vadd.xlane.f32.xlu0 %v2853_v49  ;;  %v2826_v30 = vsel %vm842_vm0, %v2760_v8, 0.0  ;;  %v2722_v7 = vmax.f32 %v2690_v29, 0.0  ;;  %v2653_v15 = vmul.f32 %v4361_v35, %v2614_v33  ;;  %v2613_v56 = vmul.f32 %v3422_v43, %v4312_v5 }
 0x3d0   : > { %v3428_v60 = vpop.eup %3427  ;;  %2827 = vadd.xlane.f32.xlu1 %v2826_v30  ;;  %v2771_v13 = vmul.f32 %v4375_v41, %v2732_v25  ;;  %v2770_v20 = vmul.f32 %v4375_v41, %v2731_v24  ;;  %v2701_v21 = vadd.f32 %v4367_v2, %v2662_v9  ;;  %v2616_v45 = vmul.f32 %v3424_v11, %v4329_v46 }
 0x3d1   : > { %v2761_v54 = vmul.f32 %v4375_v41, %v2722_v7  ;;  %v2692_v38 = vadd.f32 %v4367_v2, %v2653_v15  ;;  %v2652_v50 = vmul.f32 %v4361_v35, %v2613_v56  ;;  %v2615_v6 = vmul.f32 %v3426_v52, %v4324_v18 }
 0x3d2   : > { %v2859_v5 = vsel %vm842_vm0, %v2771_v13, 0.0  ;;  %v2856_v16 = vsel %vm842_vm0, %v2770_v20, 0.0  ;;  %v2733_v40 = vmax.f32 %v2701_v21, 0.0  ;;  %v2655_v47 = vmul.f32 %v4361_v35, %v2616_v45 }
 0x3d3   : > { %v3430_v55 = vpop.eup %3429  ;;  %2860 = vadd.xlane.f32.xlu0 %v2859_v5  ;;  %v2829_v62 = vsel %vm842_vm0, %v2761_v54, 0.0  ;;  %v2724_v46 = vmax.f32 %v2692_v38, 0.0  ;;  %v2691_v59 = vadd.f32 %v4367_v2, %v2652_v50  ;;  %v2654_v27 = vmul.f32 %v4361_v35, %v2615_v6 }
 0x3d4   : > { %2857 = vadd.xlane.f32.xlu1 %v2856_v16  ;;  %v2772_v42 = vmul.f32 %v4375_v41, %v2733_v40  ;;  %v2694_v18 = vadd.f32 %v4367_v2, %v2655_v47  ;;  %v2624_v23 = vmul.f32 %v3428_v60, %v4342_v44  ;;  %v2617_v22 = vmul.f32 %v3430_v55, %v4339_v37 }
 0x3d5   : > { %v2763_v32 = vmul.f32 %v4375_v41, %v2724_v46  ;;  %v2723_v4 = vmax.f32 %v2691_v59, 0.0  ;;  %v2693_v12 = vadd.f32 %v4367_v2, %v2654_v27 }
 0x3d6   : > { %v2862_v53 = vsel %vm842_vm0, %v2772_v42, 0.0  ;;  %v2726_v19 = vmax.f32 %v2694_v18, 0.0  ;;  %v2663_v0 = vmul.f32 %v4361_v35, %v2624_v23  ;;  %v2656_v28 = vmul.f32 %v4361_v35, %v2617_v22 }
 0x3d7   : > { %v3432_v61 = vpop.eup %3431  ;;  %2830 = vadd.xlane.f32.xlu0 %v2829_v62  ;;  %v2835_v1 = vsel %vm842_vm0, %v2763_v32, 0.0  ;;  %v2762_v44 = vmul.f32 %v4375_v41, %v2723_v4  ;;  %v2725_v3 = vmax.f32 %v2693_v12, 0.0 }
 0x3d8   : > { %2863 = vadd.xlane.f32.xlu1 %v2862_v53  ;;  %v2765_v37 = vmul.f32 %v4375_v41, %v2726_v19  ;;  %v2702_v34 = vadd.f32 %v4367_v2, %v2663_v0  ;;  %v2695_v57 = vadd.f32 %v4367_v2, %v2656_v28  ;;  %v2625_v26 = vmul.f32 %v3432_v61, %v4348_v48 }
 0x3d9   : > { %v2832_v17 = vsel %vm842_vm0, %v2762_v44, 0.0  ;;  %v2764_v43 = vmul.f32 %v4375_v41, %v2725_v3 }
 0x3da   : > { %v2734_v58 = vmax.f32 %v2702_v34, 0.0  ;;  %v2727_v31 = vmax.f32 %v2695_v57, 0.0  ;;  %v2664_v51 = vmul.f32 %v4361_v35, %v2625_v26  ;;  %v2841_v39 = vsel %vm842_vm0, %v2765_v37, 0.0 }
 0x3db   : > { %2836 = vadd.xlane.f32.xlu0 %v2835_v1  ;;  %v2838_v10 = vsel %vm842_vm0, %v2764_v43, 0.0 }
 0x3dc   : > { %2833 = vadd.xlane.f32.xlu1 %v2832_v17  ;;  %v2773_v11 = vmul.f32 %v4375_v41, %v2734_v58  ;;  %v2703_v14 = vadd.f32 %v4367_v2, %v2664_v51  ;;  %v2766_v48 = vmul.f32 %v4375_v41, %v2727_v31  ;;  %v4533_v2 = vstv %s2871_s10 }
 0x3de   : > { %v2735_v63 = vmax.f32 %v2703_v14, 0.0  ;;  %v2865_v36 = vsel %vm842_vm0, %v2773_v11, 0.0  ;;  %v2844_v35 = vsel %vm842_vm0, %v2766_v48, 0.0 }
 0x3df   : > { %2842 = vadd.xlane.f32.xlu0 %v2841_v39 }
 0x3e0   : > { %2839 = vadd.xlane.f32.xlu1 %v2838_v10  ;;  %v2774_v8 = vmul.f32 %v4375_v41, %v2735_v63 }
 0x3e2   : > { %v2868_v29 = vsel %vm842_vm0, %v2774_v8, 0.0 }
 0x3e3   : > { %2866 = vadd.xlane.f32.xlu0 %v2865_v36 }
 0x3e4   : > { %2845 = vadd.xlane.f32.xlu1 %v2844_v35 }
 0x3e8   : > { %2869 = vadd.xlane.f32.xlu1 %v2868_v29 }
 0x42b   : > { %v2801_v41 = vpop.xlane.xlu0 %2800 }
 0x42c   : > { %v2881_v33 = vadd.f32 %v4533_v2, %v2801_v41 }
 0x42e   : > { %2914 = vst.msk [vmem:[%s4540_s27 + $0x40] sm:$0xff] %vm2905_vm1, %v2881_v33 }
 0x430   : > { %v2777_v49 = vpop.xlane.xlu0 %2776 }
 0x431   : > { %v2873_v25 = vadd.f32 %v4533_v2, %v2777_v49 }
 0x432   : > { %v2804_v24 = vpop.xlane.xlu1 %2803 }
 0x433   : > { %2906 = vst.msk [vmem:[%s4540_s27] sm:$0xff] %vm2905_vm1, %v2873_v25  ;;  %v2882_v9 = vadd.f32 %v4533_v2, %v2804_v24 }
 0x435   : > { %2915 = vst.msk [vmem:[%s4540_s27 + $0x48] sm:$0xff] %vm2905_vm1, %v2882_v9  ;;  %v2807_v52 = vpop.xlane.xlu0 %2806 }
 0x436   : > { %v2883_v30 = vadd.f32 %v4533_v2, %v2807_v52 }
 0x438   : > { %2916 = vst.msk [vmem:[%s4540_s27 + $0x50] sm:$0xff] %vm2905_vm1, %v2883_v30 }
 0x439   : > { %v2780_v7 = vpop.xlane.xlu1 %2779 }
 0x43a   : > { %v2874_v15 = vadd.f32 %v4533_v2, %v2780_v7 }
 0x43b   : > { %v2813_v56 = vpop.xlane.xlu0 %2812 }
 0x43c   : > { %2907 = vst.msk [vmem:[%s4540_s27 + $0x8] sm:$0xff] %vm2905_vm1, %v2874_v15  ;;  %v2885_v13 = vadd.f32 %v4533_v2, %v2813_v56 }
 0x43d   : > { %v2810_v60 = vpop.xlane.xlu1 %2809 }
 0x43e   : > { %v2884_v20 = vadd.f32 %v4533_v2, %v2810_v60  ;;  %2918 = vst.msk [vmem:[%s4540_s27 + $0x60] sm:$0xff] %vm2905_vm1, %v2885_v13 }
 0x43f   : > { %v2783_v21 = vpop.xlane.xlu0 %2782 }
 0x440   : > { %2917 = vst.msk [vmem:[%s4540_s27 + $0x58] sm:$0xff] %vm2905_vm1, %v2884_v20  ;;  %v2875_v45 = vadd.f32 %v4533_v2, %v2783_v21 }
 0x442   : > { %v2816_v54 = vpop.xlane.xlu1 %2815  ;;  %2908 = vst.msk [vmem:[%s4540_s27 + $0x10] sm:$0xff] %vm2905_vm1, %v2875_v45 }
 0x443   : > { %v2886_v38 = vadd.f32 %v4533_v2, %v2816_v54 }
 0x445   : > { %2919 = vst.msk [vmem:[%s4540_s27 + $0x68] sm:$0xff] %vm2905_vm1, %v2886_v38  ;;  %v2789_v50 = vpop.xlane.xlu0 %2788 }
 0x446   : > { %v2786_v6 = vpop.xlane.xlu1 %2785  ;;  %v2877_v5 = vadd.f32 %v4533_v2, %v2789_v50 }
 0x447   : > { %v2876_v16 = vadd.f32 %v4533_v2, %v2786_v6 }
 0x448   : > { %2910 = vst.msk [vmem:[%s4540_s27 + $0x20] sm:$0xff] %vm2905_vm1, %v2877_v5 }
 0x449   : > { %2909 = vst.msk [vmem:[%s4540_s27 + $0x18] sm:$0xff] %vm2905_vm1, %v2876_v16  ;;  %v2819_v40 = vpop.xlane.xlu0 %2818 }
 0x44a   : > { %v2792_v47 = vpop.xlane.xlu1 %2791  ;;  %v2887_v55 = vadd.f32 %v4533_v2, %v2819_v40 }
 0x44b   : > { %v2878_v62 = vadd.f32 %v4533_v2, %v2792_v47 }
 0x44c   : > { %2920 = vst.msk [vmem:[%s4540_s27 + $0x70] sm:$0xff] %vm2905_vm1, %v2887_v55 }
 0x44d   : > { %2911 = vst.msk [vmem:[%s4540_s27 + $0x28] sm:$0xff] %vm2905_vm1, %v2878_v62  ;;  %v2849_v46 = vpop.xlane.xlu0 %2848 }
 0x44e   : > { %v2897_v59 = vadd.f32 %v4533_v2, %v2849_v46 }
 0x450   : > { %v2822_v27 = vpop.xlane.xlu1 %2821  ;;  %2930 = vst.msk [vmem:[%s4540_s27 + $0xc0] sm:$0xff] %vm2905_vm1, %v2897_v59 }
 0x451   : > { %v2888_v42 = vadd.f32 %v4533_v2, %v2822_v27 }
 0x453   : > { %2921 = vst.msk [vmem:[%s4540_s27 + $0x78] sm:$0xff] %vm2905_vm1, %v2888_v42  ;;  %v2795_v18 = vpop.xlane.xlu0 %2794 }
 0x454   : > { %v2879_v23 = vadd.f32 %v4533_v2, %v2795_v18  ;;  %v2852_v22 = vpop.xlane.xlu1 %2851 }
 0x455   : > { %v2898_v32 = vadd.f32 %v4533_v2, %v2852_v22 }
 0x456   : > { %2912 = vst.msk [vmem:[%s4540_s27 + $0x30] sm:$0xff] %vm2905_vm1, %v2879_v23 }
 0x457   : > { %2931 = vst.msk [vmem:[%s4540_s27 + $0xc8] sm:$0xff] %vm2905_vm1, %v2898_v32 }
 0x458   : > { %v2825_v4 = vpop.xlane.xlu0 %2824 }
 0x459   : > { %v2889_v12 = vadd.f32 %v4533_v2, %v2825_v4  ;;  %v2798_v53 = vpop.xlane.xlu1 %2797 }
 0x45a   : > { %v2880_v19 = vadd.f32 %v4533_v2, %v2798_v53 }
 0x45b   : > { %2922 = vst.msk [vmem:[%s4540_s27 + $0x80] sm:$0xff] %vm2905_vm1, %v2889_v12 }
 0x45c   : > { %2913 = vst.msk [vmem:[%s4540_s27 + $0x38] sm:$0xff] %vm2905_vm1, %v2880_v19  ;;  %v2855_v0 = vpop.xlane.xlu0 %2854 }
 0x45d   : > { %v2899_v28 = vadd.f32 %v4533_v2, %v2855_v0  ;;  %v2828_v61 = vpop.xlane.xlu1 %2827 }
 0x45e   : > { %v2890_v1 = vadd.f32 %v4533_v2, %v2828_v61 }
 0x45f   : > { %2932 = vst.msk [vmem:[%s4540_s27 + $0xd0] sm:$0xff] %vm2905_vm1, %v2899_v28 }
 0x460   : > { %2923 = vst.msk [vmem:[%s4540_s27 + $0x88] sm:$0xff] %vm2905_vm1, %v2890_v1  ;;  %v2861_v44 = vpop.xlane.xlu0 %2860 }
 0x461   : > { %v2901_v3 = vadd.f32 %v4533_v2, %v2861_v44  ;;  %v2858_v37 = vpop.xlane.xlu1 %2857 }
 0x462   : > { %v2900_v34 = vadd.f32 %v4533_v2, %v2858_v37 }
 0x463   : > { %2934 = vst.msk [vmem:[%s4540_s27 + $0xe0] sm:$0xff] %vm2905_vm1, %v2901_v3 }
 0x464   : > { %2933 = vst.msk [vmem:[%s4540_s27 + $0xd8] sm:$0xff] %vm2905_vm1, %v2900_v34  ;;  %v2831_v57 = vpop.xlane.xlu0 %2830 }
 0x465   : > { %v2891_v26 = vadd.f32 %v4533_v2, %v2831_v57  ;;  %v2864_v17 = vpop.xlane.xlu1 %2863 }
 0x466   : > { %v2902_v43 = vadd.f32 %v4533_v2, %v2864_v17 }
 0x467   : > { %2924 = vst.msk [vmem:[%s4540_s27 + $0x90] sm:$0xff] %vm2905_vm1, %v2891_v26 }
 0x468   : > { %2935 = vst.msk [vmem:[%s4540_s27 + $0xe8] sm:$0xff] %vm2905_vm1, %v2902_v43  ;;  %v2837_v58 = vpop.xlane.xlu0 %2836 }
 0x469   : > { %v2893_v31 = vadd.f32 %v4533_v2, %v2837_v58  ;;  %v2834_v51 = vpop.xlane.xlu1 %2833 }
 0x46a   : > { %v2892_v39 = vadd.f32 %v4533_v2, %v2834_v51 }
 0x46b   : > { %2926 = vst.msk [vmem:[%s4540_s27 + $0xa0] sm:$0xff] %vm2905_vm1, %v2893_v31 }
 0x46c   : > { %2925 = vst.msk [vmem:[%s4540_s27 + $0x98] sm:$0xff] %vm2905_vm1, %v2892_v39  ;;  %v2843_v11 = vpop.xlane.xlu0 %2842 }
 0x46d   : > { %v2895_v14 = vadd.f32 %v4533_v2, %v2843_v11  ;;  %v2840_v10 = vpop.xlane.xlu1 %2839 }
 0x46e   : > { %v2894_v48 = vadd.f32 %v4533_v2, %v2840_v10 }
 0x46f   : > { %2928 = vst.msk [vmem:[%s4540_s27 + $0xb0] sm:$0xff] %vm2905_vm1, %v2895_v14 }
 0x470   : > { %2927 = vst.msk [vmem:[%s4540_s27 + $0xa8] sm:$0xff] %vm2905_vm1, %v2894_v48  ;;  %v2867_v63 = vpop.xlane.xlu0 %2866 }
 0x471   : > { %v2903_v36 = vadd.f32 %v4533_v2, %v2867_v63  ;;  %v2846_v35 = vpop.xlane.xlu1 %2845 }
 0x472   : > { %v2896_v8 = vadd.f32 %v4533_v2, %v2846_v35 }
 0x473   : > { %2936 = vst.msk [vmem:[%s4540_s27 + $0xf0] sm:$0xff] %vm2905_vm1, %v2903_v36 }
 0x474   : > { %2929 = vst.msk [vmem:[%s4540_s27 + $0xb8] sm:$0xff] %vm2905_vm1, %v2896_v8 }
 0x475   : > { %v2870_v29 = vpop.xlane.xlu1 %2869 }
 0x476   : > { %v2904_v41 = vadd.f32 %v4533_v2, %v2870_v29 }
 0x478   : > { %2937 = vst.msk [vmem:[%s4540_s27 + $0xf8] sm:$0xff] %vm2905_vm1, %v2904_v41 }
 0x479 PF: > { %s22_s19 = sadd.s32 1, %s3443_s19  }
 0x47a   : > { %p19_p5 = scmp.ge.s32.totalorder %s22_s19, 4  }
 0x47c   :  { %21 = sbr.rel (!%p19_p5) target bundleno = 2 (0x2), region = 97 }

</bundles_post_ra>
